<compile_context>
chip_gen: v7x
topology: tpu7x:2x2x1
jax: 0.10.0
libtpu: 0.0.40
codegen_flags: <defaults>
</compile_context>

<pallas_src>
import functools

import jax
import jax.numpy as jnp
import numpy as np
from jax import lax
from jax.experimental import pallas as pl
from jax.experimental.pallas import tpu as pltpu


def _round_up(x, m):
    return ((x + m - 1) // m) * m


def _padded_tile_bytes(rows, cols, itemsize=4):
    """VMEM footprint of a (rows, cols) f32/i32 tile after (8, 128) padding."""
    return _round_up(max(rows, 1), 8) * _round_up(max(cols, 1), 128) * itemsize


def _vmem_limit(block_bytes):
    """vmem_limit_bytes derived from double-buffered block footprints + slack."""
    need = 2 * block_bytes + (8 << 20)
    return int(max(32 << 20, min(need, 100 << 20)))


# ----------------------------------------------------------------------------
# Kernel 1: hidden part of the edge feed-forward network.
#   refs = [adj, dist, W0, b0, W1, b1, ..., W_{L-1}, b_{L-1}, z_out]
# ----------------------------------------------------------------------------
def _edge_hidden_mlp_kernel(adj_ref, dist_ref, w0_ref, b0_ref, *refs):
    z_ref = refs[-1]
    wb_refs = refs[:-1]                 # (W, b) pairs for hidden layers 1..L-1

    adj = adj_ref[...]                  # [tm, 1] int32
    dist = dist_ref[...]                # [tm, 1] f32
    w0 = w0_ref[...]                    # [E+1, H]
    b0 = b0_ref[...]                    # [1, H]
    num_edge_class = w0.shape[0] - 1

    # Layer 0: one_hot(adj) @ W0[:E] + dist * W0[E] + b0 as a masked embedding
    # sum (pure VPU; no one-hot tensor in HBM, no degenerate K=(E+1) matmul).
    h = dist * w0[num_edge_class:num_edge_class + 1, :] + b0      # [tm, H]
    for e in range(num_edge_class):
        sel = (adj == e).astype(jnp.float32)                      # [tm, 1]
        h = h + sel * w0[e:e + 1, :]
    h = jnp.maximum(h, 0.0)

    # Hidden layers 1..L-1 (Linear + ReLU), weights resident in VMEM.
    for li in range(len(wb_refs) // 2):
        w = wb_refs[2 * li][...]
        b = wb_refs[2 * li + 1][...]
        h = jnp.maximum(
            jnp.dot(h, w, preferred_element_type=jnp.float32) + b, 0.0)

    # TODO(synk): when H % 128 != 0 the z store is lane-masked; a (tm//g, g*H)
    # in-kernel repack would make it lane-dense but needs a sublane->lane
    # reshape whose lowering is shape-dependent, so it is left out here.
    z_ref[...] = h


def edge_hidden_mlp(adj_flat, dist_flat, hidden_params, *, tm=1024):
    """adj_flat/dist_flat: [M, 1] -> z: [Mp, H] (Mp >= M, caller slices [:M])."""
    M = adj_flat.shape[0]
    H = hidden_params[0][0].shape[1]

    tm = min(tm, _round_up(M, 8))
    n_blocks = pl.cdiv(M, tm)          # no forced-even grid (single-TC v5e/v6e)
    Mp = n_blocks * tm
    if Mp != M:
        adj_flat = jnp.pad(adj_flat, ((0, Mp - M), (0, 0)))
        dist_flat = jnp.pad(dist_flat, ((0, Mp - M), (0, 0)))

    flat_params = []
    in_specs = [pl.BlockSpec((tm, 1), lambda i: (i, 0)),
                pl.BlockSpec((tm, 1), lambda i: (i, 0))]
    block_bytes = 2 * _padded_tile_bytes(tm, 1)
    for (w, b) in hidden_params:
        flat_params.extend([w, b])
        in_specs.append(pl.BlockSpec(w.shape, lambda i: (0, 0)))  # resident
        in_specs.append(pl.BlockSpec(b.shape, lambda i: (0, 0)))
        block_bytes += _padded_tile_bytes(*w.shape) + _padded_tile_bytes(*b.shape)
    block_bytes += _padded_tile_bytes(tm, H)

    return pl.pallas_call(
        _edge_hidden_mlp_kernel,
        out_shape=jax.ShapeDtypeStruct((Mp, H), jnp.float32),
        grid=(n_blocks,),
        in_specs=in_specs,
        out_specs=pl.BlockSpec((tm, H), lambda i: (i, 0)),
        compiler_params=pltpu.CompilerParams(
            dimension_semantics=("parallel",),
            vmem_limit_bytes=_vmem_limit(block_bytes)),
    )(adj_flat, dist_flat, *flat_params)


# ----------------------------------------------------------------------------
# Kernel 2: fused message contraction + bias + concat, per (batch, v-tile).
#   zr_ref  : [1, tv, N*H]  z rows     (in-direction LHS, no in-kernel reshape)
#   zc_ref  : [1, N, tv, H] z columns  (out-direction, w on the leading dim)
#   wh_ref  : [1, N*H, D]   last layer folded against node_states (shared RHS)
#   bias_ref: [1, 1, 2*D]   folded last-layer bias + message_bias
#   out_ref : [1, tv, 2*D]  final messages block
# ----------------------------------------------------------------------------
def _message_kernel(zr_ref, zc_ref, wh_ref, bias_ref, out_ref):
    N = zc_ref.shape[1]
    tv = zc_ref.shape[2]
    H = zc_ref.shape[3]
    D = wh_ref.shape[2]

    wh = wh_ref[0]                                              # [N*H, D] resident

    # In-direction: one MXU pass over the full (w, h) contraction.
    m_in = jnp.dot(zr_ref[0], wh, preferred_element_type=jnp.float32)    # [tv, D]

    # Out-direction: z is read column-blocked (w leading), so contract one w-slab
    # at a time against the same resident wh — no z transpose in HBM or VMEM.
    def body(w, acc):
        z_w = zc_ref[0, w]                                      # [tv, H]
        wh_w = wh_ref[0, pl.ds(pl.multiple_of(w * H, H), H), :]  # [H, D]
        return acc + jnp.dot(z_w, wh_w, preferred_element_type=jnp.float32)

    m_out = lax.fori_loop(0, N, body, jnp.zeros((tv, D), jnp.float32))   # [tv, D]

    # Fused epilogue: concat + both biases, single lane-dense [tv, 2D] store.
    out_ref[0] = jnp.concatenate([m_in, m_out], axis=1) + bias_ref[0]


def message_pass(z4, wh_flat, bias_full, *, vmem_budget_bytes=12 << 20):
    """z4: [B, N, N, H], wh_flat: [B, N*H, D], bias_full: [B, 1, 2D] -> [B, N, 2D]."""
    B, N, _, H = z4.shape
    D = wh_flat.shape[-1]
    NH = N * H
    z_rows = z4.reshape(B, N, NH)       # free (row-major) second view of z

    def blocks_bytes(tv):
        return (_padded_tile_bytes(tv, NH)             # z rows block
                + N * _padded_tile_bytes(tv, H)        # z cols block
                + _padded_tile_bytes(NH, D)            # wh block
                + _padded_tile_bytes(1, 2 * D)         # bias block
                + _padded_tile_bytes(tv, 2 * D))       # output block

    # v-tiling keeps per-step VMEM bounded (v7x: 64 MiB physical).
    tv = N
    while blocks_bytes(tv) > vmem_budget_bytes and tv > 8:
        tv = max(8, _round_up(tv // 2, 8))
    nv = pl.cdiv(N, tv)

    return pl.pallas_call(
        _message_kernel,
        out_shape=jax.ShapeDtypeStruct((B, N, 2 * D), jnp.float32),
        grid=(B, nv),
        in_specs=[
            pl.BlockSpec((1, tv, NH), lambda b, v: (b, v, 0)),
            pl.BlockSpec((1, N, tv, H), lambda b, v: (b, 0, v, 0)),
            pl.BlockSpec((1, NH, D), lambda b, v: (b, 0, 0)),
            pl.BlockSpec((1, 1, 2 * D), lambda b, v: (b, 0, 0)),
        ],
        out_specs=pl.BlockSpec((1, tv, 2 * D), lambda b, v: (b, v, 0)),
        compiler_params=pltpu.CompilerParams(
            dimension_semantics=("parallel", "parallel"),
            vmem_limit_bytes=_vmem_limit(blocks_bytes(tv))),
    )(z_rows, z4, wh_flat, bias_full)


# ----------------------------------------------------------------------------
# EdgeNetwork forward (reuse_graph=False path).
# TODO(synk): reuse_graph=True caching of self._adjacency_{in,out} is stateful
# nn.Module behaviour; here the graph contribution is recomputed on every call.
# ----------------------------------------------------------------------------
@functools.partial(jax.jit, static_argnames=("num_edge_class", "node_dim"))
def edge_network_forward(node_states, adjacency_in, distance, params,
                         message_bias, *, num_edge_class, node_dim):
    B, N, D = node_states.shape
    assert D == node_dim
    hidden_params = params[:-1]
    w_last, b_last = params[-1]                         # [H, D*D], [1, D*D]
    H = hidden_params[0][0].shape[1]
    M = B * N * N

    adj_flat = adjacency_in.reshape(M, 1)
    dist_flat = distance.astype(jnp.float32).reshape(M, 1)

    # --- Pallas kernel 1: per-edge hidden activations z (in-direction only) ---
    z = edge_hidden_mlp(adj_flat, dist_flat, hidden_params)[:M]
    z4 = z.reshape(B, N, N, H)                          # z4[b, v, w, h]

    # --- glue: fold the last Linear(H -> D*D) into the contraction (HIGH,
    #     ~f32-accurate 3-pass, instead of 6-pass HIGHEST) -----------------------
    wh = jnp.einsum('hij,bwj->bwhi', w_last.reshape(H, D, D), node_states,
                    precision=lax.Precision.HIGH)               # [B, N, H, D]
    wh_flat = wh.reshape(B, N * H, D)
    bias_term = jnp.einsum('ij,bwj->bi', b_last.reshape(D, D), node_states,
                           precision=lax.Precision.HIGH)        # [B, D]
    bias_full = (jnp.concatenate([bias_term, bias_term], axis=-1)
                 + message_bias[None, :]).reshape(B, 1, 2 * D)  # [B, 1, 2D]

    # --- Pallas kernel 2: both directions + biases + concat, fused ------------
    return message_pass(z4, wh_flat, bias_full)                 # [B, N, 2D]


# ----------------------------------------------------------------------------
# Pure-JAX reference (mirrors the PyTorch forward) for validation.
# ----------------------------------------------------------------------------
def reference_forward(node_states, adjacency_in, distance, params,
                      message_bias, *, num_edge_class, node_dim):
    B, N, D = node_states.shape
    one_hot = jax.nn.one_hot(adjacency_in, num_edge_class, dtype=jnp.float32)
    feats_in = jnp.concatenate([one_hot, distance[..., None]], axis=-1)
    feats_out = jnp.transpose(feats_in, (0, 2, 1, 3))

    def mlp(x):
        h = x
        for (w, b) in params[:-1]:
            h = jax.nn.relu(h @ w + b)
        w, b = params[-1]
        return h @ w + b

    a_in = mlp(feats_in).reshape(B, N, N, D, D)
    a_out = mlp(feats_out).reshape(B, N, N, D, D)
    m_in = jnp.einsum("bvwij,bwj->bvi", a_in, node_states)
    m_out = jnp.einsum("bvwij,bwj->bvi", a_out, node_states)
    return jnp.concatenate([m_in, m_out], axis=2) + message_bias


# ----------------------------------------------------------------------------
def init_params(key, num_edge_class, node_dim, edge_num_layers, edge_hidden_dim):
    """feed_forward(num_edge_class+1, L, H, node_dim**2) parameter shapes."""
    dims = ([num_edge_class + 1]
            + [edge_hidden_dim] * edge_num_layers
            + [node_dim * node_dim])
    params = []
    for i in range(len(dims) - 1):
        key, kw, kb = jax.random.split(key, 3)
        w = 0.1 * jax.random.normal(kw, (dims[i], dims[i + 1]), jnp.float32)
        b = 0.01 * jax.random.normal(kb, (1, dims[i + 1]), jnp.float32)
        params.append((w, b))
    return params


if __name__ == "__main__":
    # Small, module-consistent shapes.
    B, N = 2, 8            # batch, number of nodes
    num_edge_class = 4
    node_dim = 8           # D (module default 50; small for the demo)
    edge_num_layers = 4
    edge_hidden_dim = 16   # H

    key = jax.random.PRNGKey(0)
    k_param, k_node, k_adj, k_dist = jax.random.split(key, 4)

    params = init_params(k_param, num_edge_class, node_dim,
                         edge_num_layers, edge_hidden_dim)
    message_bias = jnp.zeros((2 * node_dim,), jnp.float32)  # nn.Parameter(zeros)

    node_states = jax.random.normal(k_node, (B, N, node_dim), jnp.float32)
    adjacency_in = jax.random.randint(k_adj, (B, N, N), 0, num_edge_class,
                                      dtype=jnp.int32)
    distance = jax.random.uniform(k_dist, (B, N, N), jnp.float32)

    out = edge_network_forward(node_states, adjacency_in, distance, params,
                               message_bias, num_edge_class=num_edge_class,
                               node_dim=node_dim)
    out = jax.block_until_ready(out)

    with jax.default_matmul_precision("highest"):
        ref = reference_forward(node_states, adjacency_in, distance, params,
                                message_bias, num_edge_class=num_edge_class,
                                node_dim=node_dim)

    assert out.shape == (B, N, 2 * node_dim), out.shape
    np.testing.assert_allclose(np.asarray(out), np.asarray(ref),
                               rtol=5e-3, atol=5e-3)
    print("KERNEL_OK")
</pallas_src>

<mosaic_0001>
module attributes {stable_mosaic.version = 11 : i64} {
  func.func @_edge_hidden_mlp_kernel(%arg0: i32, %arg1: memref<128x1xi32, #tpu.memory_space<vmem>>, %arg2: memref<128x1xf32, #tpu.memory_space<vmem>>, %arg3: memref<5x16xf32, #tpu.memory_space<vmem>>, %arg4: memref<1x16xf32, #tpu.memory_space<vmem>>, %arg5: memref<16x16xf32, #tpu.memory_space<vmem>>, %arg6: memref<1x16xf32, #tpu.memory_space<vmem>>, %arg7: memref<16x16xf32, #tpu.memory_space<vmem>>, %arg8: memref<1x16xf32, #tpu.memory_space<vmem>>, %arg9: memref<16x16xf32, #tpu.memory_space<vmem>>, %arg10: memref<1x16xf32, #tpu.memory_space<vmem>>, %arg11: memref<128x16xf32, #tpu.memory_space<vmem>>) attributes {dimension_semantics = [#tpu.dimension_semantics<parallel>], iteration_bounds = array<i64: 1>, scalar_prefetch = 0 : i64, scratch_operands = 0 : i64, tpu.core_type = #tpu.core_type<tc>, window_params = [{transform_indices = @transform_0, window_bounds = array<i64: 128, 1>}, {transform_indices = @transform_1, window_bounds = array<i64: 128, 1>}, {pipeline_mode = #tpu.pipeline_mode<synchronous>, transform_indices = @transform_2, window_bounds = array<i64: 5, 16>}, {pipeline_mode = #tpu.pipeline_mode<synchronous>, transform_indices = @transform_3, window_bounds = array<i64: 1, 16>}, {pipeline_mode = #tpu.pipeline_mode<synchronous>, transform_indices = @transform_4, window_bounds = array<i64: 16, 16>}, {pipeline_mode = #tpu.pipeline_mode<synchronous>, transform_indices = @transform_5, window_bounds = array<i64: 1, 16>}, {pipeline_mode = #tpu.pipeline_mode<synchronous>, transform_indices = @transform_6, window_bounds = array<i64: 16, 16>}, {pipeline_mode = #tpu.pipeline_mode<synchronous>, transform_indices = @transform_7, window_bounds = array<i64: 1, 16>}, {pipeline_mode = #tpu.pipeline_mode<synchronous>, transform_indices = @transform_8, window_bounds = array<i64: 16, 16>}, {pipeline_mode = #tpu.pipeline_mode<synchronous>, transform_indices = @transform_9, window_bounds = array<i64: 1, 16>}, {transform_indices = @transform_10, window_bounds = array<i64: 128, 16>}]} {
    %c0 = arith.constant 0 : index
    %c0_0 = arith.constant 0 : index
    %0 = vector.load %arg1[%c0, %c0_0] : memref<128x1xi32, #tpu.memory_space<vmem>>, vector<128x1xi32>
    %c0_1 = arith.constant 0 : index
    %c0_2 = arith.constant 0 : index
    %1 = vector.load %arg2[%c0_1, %c0_2] : memref<128x1xf32, #tpu.memory_space<vmem>>, vector<128x1xf32>
    %c0_3 = arith.constant 0 : index
    %c0_4 = arith.constant 0 : index
    %2 = vector.load %arg3[%c0_3, %c0_4] : memref<5x16xf32, #tpu.memory_space<vmem>>, vector<5x16xf32>
    %c0_5 = arith.constant 0 : index
    %c0_6 = arith.constant 0 : index
    %3 = vector.load %arg4[%c0_5, %c0_6] : memref<1x16xf32, #tpu.memory_space<vmem>>, vector<1x16xf32>
    %4 = vector.extract_strided_slice %2 {offsets = [4, 0], sizes = [1, 16], strides = [1, 1]} : vector<5x16xf32> to vector<1x16xf32>
    %5 = vector.broadcast %1 : vector<128x1xf32> to vector<128x16xf32>
    %6 = vector.broadcast %4 : vector<1x16xf32> to vector<128x16xf32>
    %7 = arith.mulf %5, %6 : vector<128x16xf32>
    %8 = vector.broadcast %3 : vector<1x16xf32> to vector<128x16xf32>
    %9 = arith.addf %7, %8 : vector<128x16xf32>
    %c0_i32 = arith.constant 0 : i32
    %10 = vector.broadcast %c0_i32 : i32 to vector<128x1xi32>
    %11 = arith.cmpi eq, %0, %10 : vector<128x1xi32>
    %12 = arith.extui %11 : vector<128x1xi1> to vector<128x1xi32>
    %13 = arith.sitofp %12 : vector<128x1xi32> to vector<128x1xf32>
    %14 = vector.extract_strided_slice %2 {offsets = [0, 0], sizes = [1, 16], strides = [1, 1]} : vector<5x16xf32> to vector<1x16xf32>
    %15 = vector.broadcast %13 : vector<128x1xf32> to vector<128x16xf32>
    %16 = vector.broadcast %14 : vector<1x16xf32> to vector<128x16xf32>
    %17 = arith.mulf %15, %16 : vector<128x16xf32>
    %18 = arith.addf %9, %17 : vector<128x16xf32>
    %c1_i32 = arith.constant 1 : i32
    %19 = vector.broadcast %c1_i32 : i32 to vector<128x1xi32>
    %20 = arith.cmpi eq, %0, %19 : vector<128x1xi32>
    %21 = arith.extui %20 : vector<128x1xi1> to vector<128x1xi32>
    %22 = arith.sitofp %21 : vector<128x1xi32> to vector<128x1xf32>
    %23 = vector.extract_strided_slice %2 {offsets = [1, 0], sizes = [1, 16], strides = [1, 1]} : vector<5x16xf32> to vector<1x16xf32>
    %24 = vector.broadcast %22 : vector<128x1xf32> to vector<128x16xf32>
    %25 = vector.broadcast %23 : vector<1x16xf32> to vector<128x16xf32>
    %26 = arith.mulf %24, %25 : vector<128x16xf32>
    %27 = arith.addf %18, %26 : vector<128x16xf32>
    %c2_i32 = arith.constant 2 : i32
    %28 = vector.broadcast %c2_i32 : i32 to vector<128x1xi32>
    %29 = arith.cmpi eq, %0, %28 : vector<128x1xi32>
    %30 = arith.extui %29 : vector<128x1xi1> to vector<128x1xi32>
    %31 = arith.sitofp %30 : vector<128x1xi32> to vector<128x1xf32>
    %32 = vector.extract_strided_slice %2 {offsets = [2, 0], sizes = [1, 16], strides = [1, 1]} : vector<5x16xf32> to vector<1x16xf32>
    %33 = vector.broadcast %31 : vector<128x1xf32> to vector<128x16xf32>
    %34 = vector.broadcast %32 : vector<1x16xf32> to vector<128x16xf32>
    %35 = arith.mulf %33, %34 : vector<128x16xf32>
    %36 = arith.addf %27, %35 : vector<128x16xf32>
    %c3_i32 = arith.constant 3 : i32
    %37 = vector.broadcast %c3_i32 : i32 to vector<128x1xi32>
    %38 = arith.cmpi eq, %0, %37 : vector<128x1xi32>
    %39 = arith.extui %38 : vector<128x1xi1> to vector<128x1xi32>
    %40 = arith.sitofp %39 : vector<128x1xi32> to vector<128x1xf32>
    %41 = vector.extract_strided_slice %2 {offsets = [3, 0], sizes = [1, 16], strides = [1, 1]} : vector<5x16xf32> to vector<1x16xf32>
    %42 = vector.broadcast %40 : vector<128x1xf32> to vector<128x16xf32>
    %43 = vector.broadcast %41 : vector<1x16xf32> to vector<128x16xf32>
    %44 = arith.mulf %42, %43 : vector<128x16xf32>
    %45 = arith.addf %36, %44 : vector<128x16xf32>
    %cst = arith.constant 0.000000e+00 : f32
    %46 = vector.broadcast %cst : f32 to vector<128x16xf32>
    %47 = arith.maximumf %45, %46 : vector<128x16xf32>
    %c0_7 = arith.constant 0 : index
    %c0_8 = arith.constant 0 : index
    %48 = vector.load %arg5[%c0_7, %c0_8] : memref<16x16xf32, #tpu.memory_space<vmem>>, vector<16x16xf32>
    %c0_9 = arith.constant 0 : index
    %c0_10 = arith.constant 0 : index
    %49 = vector.load %arg6[%c0_9, %c0_10] : memref<1x16xf32, #tpu.memory_space<vmem>>, vector<1x16xf32>
    %cst_11 = arith.constant dense<0.000000e+00> : vector<128x16xf32>
    %50 = tpu.matmul %47, %48, %cst_11 {dimension_numbers = #tpu.dot_dimension_numbers<[1], [0], [0], [1], [0, 0, 1, 1], [], []>} : vector<128x16xf32>, vector<16x16xf32>, vector<128x16xf32> -> vector<128x16xf32>
    %51 = vector.broadcast %49 : vector<1x16xf32> to vector<128x16xf32>
    %52 = arith.addf %50, %51 : vector<128x16xf32>
    %cst_12 = arith.constant 0.000000e+00 : f32
    %53 = vector.broadcast %cst_12 : f32 to vector<128x16xf32>
    %54 = arith.maximumf %52, %53 : vector<128x16xf32>
    %c0_13 = arith.constant 0 : index
    %c0_14 = arith.constant 0 : index
    %55 = vector.load %arg7[%c0_13, %c0_14] : memref<16x16xf32, #tpu.memory_space<vmem>>, vector<16x16xf32>
    %c0_15 = arith.constant 0 : index
    %c0_16 = arith.constant 0 : index
    %56 = vector.load %arg8[%c0_15, %c0_16] : memref<1x16xf32, #tpu.memory_space<vmem>>, vector<1x16xf32>
    %cst_17 = arith.constant dense<0.000000e+00> : vector<128x16xf32>
    %57 = tpu.matmul %54, %55, %cst_17 {dimension_numbers = #tpu.dot_dimension_numbers<[1], [0], [0], [1], [0, 0, 1, 1], [], []>} : vector<128x16xf32>, vector<16x16xf32>, vector<128x16xf32> -> vector<128x16xf32>
    %58 = vector.broadcast %56 : vector<1x16xf32> to vector<128x16xf32>
    %59 = arith.addf %57, %58 : vector<128x16xf32>
    %cst_18 = arith.constant 0.000000e+00 : f32
    %60 = vector.broadcast %cst_18 : f32 to vector<128x16xf32>
    %61 = arith.maximumf %59, %60 : vector<128x16xf32>
    %c0_19 = arith.constant 0 : index
    %c0_20 = arith.constant 0 : index
    %62 = vector.load %arg9[%c0_19, %c0_20] : memref<16x16xf32, #tpu.memory_space<vmem>>, vector<16x16xf32>
    %c0_21 = arith.constant 0 : index
    %c0_22 = arith.constant 0 : index
    %63 = vector.load %arg10[%c0_21, %c0_22] : memref<1x16xf32, #tpu.memory_space<vmem>>, vector<1x16xf32>
    %cst_23 = arith.constant dense<0.000000e+00> : vector<128x16xf32>
    %64 = tpu.matmul %61, %62, %cst_23 {dimension_numbers = #tpu.dot_dimension_numbers<[1], [0], [0], [1], [0, 0, 1, 1], [], []>} : vector<128x16xf32>, vector<16x16xf32>, vector<128x16xf32> -> vector<128x16xf32>
    %65 = vector.broadcast %63 : vector<1x16xf32> to vector<128x16xf32>
    %66 = arith.addf %64, %65 : vector<128x16xf32>
    %cst_24 = arith.constant 0.000000e+00 : f32
    %67 = vector.broadcast %cst_24 : f32 to vector<128x16xf32>
    %68 = arith.maximumf %66, %67 : vector<128x16xf32>
    %c0_25 = arith.constant 0 : index
    %c0_26 = arith.constant 0 : index
    %69 = vector.load %arg11[%c0_25, %c0_26] : memref<128x16xf32, #tpu.memory_space<vmem>>, vector<128x16xf32>
    tpu.vector_store %arg11[%c0_25, %c0_26], %68 {strides = array<i32>} : memref<128x16xf32, #tpu.memory_space<vmem>>, vector<128x16xf32>,
    return
  }
  func.func @transform_0(%arg0: i32) -> (i32, i32) {
    %c0_i32 = arith.constant 0 : i32
    %c0_i32_0 = arith.constant 0 : i32
    return %arg0, %c0_i32 : i32, i32
  }
  func.func @transform_1(%arg0: i32) -> (i32, i32) {
    %c0_i32 = arith.constant 0 : i32
    %c0_i32_0 = arith.constant 0 : i32
    return %arg0, %c0_i32 : i32, i32
  }
  func.func @transform_2(%arg0: i32) -> (i32, i32) {
    %c0_i32 = arith.constant 0 : i32
    %c0_i32_0 = arith.constant 0 : i32
    %c0_i32_1 = arith.constant 0 : i32
    return %c0_i32, %c0_i32_0 : i32, i32
  }
  func.func @transform_3(%arg0: i32) -> (i32, i32) {
    %c0_i32 = arith.constant 0 : i32
    %c0_i32_0 = arith.constant 0 : i32
    %c0_i32_1 = arith.constant 0 : i32
    return %c0_i32, %c0_i32_0 : i32, i32
  }
  func.func @transform_4(%arg0: i32) -> (i32, i32) {
    %c0_i32 = arith.constant 0 : i32
    %c0_i32_0 = arith.constant 0 : i32
    %c0_i32_1 = arith.constant 0 : i32
    return %c0_i32, %c0_i32_0 : i32, i32
  }
  func.func @transform_5(%arg0: i32) -> (i32, i32) {
    %c0_i32 = arith.constant 0 : i32
    %c0_i32_0 = arith.constant 0 : i32
    %c0_i32_1 = arith.constant 0 : i32
    return %c0_i32, %c0_i32_0 : i32, i32
  }
  func.func @transform_6(%arg0: i32) -> (i32, i32) {
    %c0_i32 = arith.constant 0 : i32
    %c0_i32_0 = arith.constant 0 : i32
    %c0_i32_1 = arith.constant 0 : i32
    return %c0_i32, %c0_i32_0 : i32, i32
  }
  func.func @transform_7(%arg0: i32) -> (i32, i32) {
    %c0_i32 = arith.constant 0 : i32
    %c0_i32_0 = arith.constant 0 : i32
    %c0_i32_1 = arith.constant 0 : i32
    return %c0_i32, %c0_i32_0 : i32, i32
  }
  func.func @transform_8(%arg0: i32) -> (i32, i32) {
    %c0_i32 = arith.constant 0 : i32
    %c0_i32_0 = arith.constant 0 : i32
    %c0_i32_1 = arith.constant 0 : i32
    return %c0_i32, %c0_i32_0 : i32, i32
  }
  func.func @transform_9(%arg0: i32) -> (i32, i32) {
    %c0_i32 = arith.constant 0 : i32
    %c0_i32_0 = arith.constant 0 : i32
    %c0_i32_1 = arith.constant 0 : i32
    return %c0_i32, %c0_i32_0 : i32, i32
  }
  func.func @transform_10(%arg0: i32) -> (i32, i32) {
    %c0_i32 = arith.constant 0 : i32
    %c0_i32_0 = arith.constant 0 : i32
    return %arg0, %c0_i32 : i32, i32
  }
}

module attributes {stable_mosaic.version = 11 : i64} {
  func.func @_message_kernel(%arg0: i32, %arg1: i32, %arg2: memref<1x8x128xf32, #tpu.memory_space<vmem>>, %arg3: memref<1x8x8x16xf32, #tpu.memory_space<vmem>>, %arg4: memref<1x128x8xf32, #tpu.memory_space<vmem>>, %arg5: memref<1x1x16xf32, #tpu.memory_space<vmem>>, %arg6: memref<1x8x16xf32, #tpu.memory_space<vmem>>) attributes {dimension_semantics = [#tpu.dimension_semantics<parallel>, #tpu.dimension_semantics<parallel>], iteration_bounds = array<i64: 2, 1>, scalar_prefetch = 0 : i64, scratch_operands = 0 : i64, tpu.core_type = #tpu.core_type<tc>, window_params = [{transform_indices = @transform_0, window_bounds = array<i64: 1, 8, 128>}, {transform_indices = @transform_1, window_bounds = array<i64: 1, 8, 8, 16>}, {transform_indices = @transform_2, window_bounds = array<i64: 1, 128, 8>}, {transform_indices = @transform_3, window_bounds = array<i64: 1, 1, 16>}, {transform_indices = @transform_4, window_bounds = array<i64: 1, 8, 16>}]} {
    %c0 = arith.constant 0 : index
    %c0_0 = arith.constant 0 : index
    %c0_1 = arith.constant 0 : index
    %0 = vector.load %arg4[%c0, %c0_0, %c0_1] : memref<1x128x8xf32, #tpu.memory_space<vmem>>, vector<1x128x8xf32>
    %1 = vector.shape_cast %0 : vector<1x128x8xf32> to vector<128x8xf32>
    %c0_2 = arith.constant 0 : index
    %c0_3 = arith.constant 0 : index
    %c0_4 = arith.constant 0 : index
    %2 = vector.load %arg2[%c0_2, %c0_3, %c0_4] : memref<1x8x128xf32, #tpu.memory_space<vmem>>, vector<1x8x128xf32>
    %3 = vector.shape_cast %2 : vector<1x8x128xf32> to vector<8x128xf32>
    %cst = arith.constant dense<0.000000e+00> : vector<8x8xf32>
    %4 = tpu.matmul %3, %1, %cst {dimension_numbers = #tpu.dot_dimension_numbers<[1], [0], [0], [1], [0, 0, 1, 1], [], []>} : vector<8x128xf32>, vector<128x8xf32>, vector<8x8xf32> -> vector<8x8xf32>
    %cst_5 = arith.constant 0.000000e+00 : f32
    %5 = vector.broadcast %cst_5 : f32 to vector<8x8xf32>
    %c0_i32 = arith.constant 0 : i32
    %c8_i32 = arith.constant 8 : i32
    %6 = arith.addi %c0_i32, %c8_i32 : i32
    %c1_i32 = arith.constant 1 : i32
    %7 = scf.for %arg7 = %c0_i32 to %6 step %c1_i32 iter_args(%arg8 = %5) -> (vector<8x8xf32>)  : i32 {
      %c0_13 = arith.constant 0 : index
      %16 = arith.index_cast %arg7 : i32 to index
      %c0_14 = arith.constant 0 : index
      %c0_15 = arith.constant 0 : index
      %17 = vector.load %arg3[%c0_13, %16, %c0_14, %c0_15] : memref<1x8x8x16xf32, #tpu.memory_space<vmem>>, vector<1x1x8x16xf32>
      %18 = vector.shape_cast %17 : vector<1x1x8x16xf32> to vector<8x16xf32>
      %c16_i32 = arith.constant 16 : i32
      %19 = arith.muli %arg7, %c16_i32 : i32
      %20 = tpu.assume_multiple %19, 16 : i32
      %c0_16 = arith.constant 0 : index
      %21 = arith.index_cast %20 : i32 to index
      %c0_17 = arith.constant 0 : index
      %22 = vector.load %arg4[%c0_16, %21, %c0_17] : memref<1x128x8xf32, #tpu.memory_space<vmem>>, vector<1x16x8xf32>
      %23 = vector.shape_cast %22 : vector<1x16x8xf32> to vector<16x8xf32>
      %cst_18 = arith.constant dense<0.000000e+00> : vector<8x8xf32>
      %24 = tpu.matmul %18, %23, %cst_18 {dimension_numbers = #tpu.dot_dimension_numbers<[1], [0], [0], [1], [0, 0, 1, 1], [], []>} : vector<8x16xf32>, vector<16x8xf32>, vector<8x8xf32> -> vector<8x8xf32>
      %25 = arith.addf %arg8, %24 : vector<8x8xf32>
      scf.yield %25 : vector<8x8xf32>
    }
    %c8_i32_6 = arith.constant 8 : i32
    %8 = tpu.concatenate %4, %7 in 1 : vector<8x8xf32>, vector<8x8xf32> -> vector<8x16xf32>
    %c0_7 = arith.constant 0 : index
    %c0_8 = arith.constant 0 : index
    %c0_9 = arith.constant 0 : index
    %9 = vector.load %arg5[%c0_7, %c0_8, %c0_9] : memref<1x1x16xf32, #tpu.memory_space<vmem>>, vector<1x1x16xf32>
    %10 = vector.shape_cast %9 : vector<1x1x16xf32> to vector<1x16xf32>
    %11 = vector.broadcast %10 : vector<1x16xf32> to vector<8x16xf32>
    %12 = arith.addf %8, %11 : vector<8x16xf32>
    %c0_10 = arith.constant 0 : index
    %c0_11 = arith.constant 0 : index
    %c0_12 = arith.constant 0 : index
    %13 = vector.load %arg6[%c0_10, %c0_11, %c0_12] : memref<1x8x16xf32, #tpu.memory_space<vmem>>, vector<1x8x16xf32>
    %14 = vector.shape_cast %13 : vector<1x8x16xf32> to vector<8x16xf32>
    %15 = vector.shape_cast %12 : vector<8x16xf32> to vector<1x8x16xf32>
    tpu.vector_store %arg6[%c0_10, %c0_11, %c0_12], %15 {strides = array<i32>} : memref<1x8x16xf32, #tpu.memory_space<vmem>>, vector<1x8x16xf32>,
    return
  }
  func.func @transform_0(%arg0: i32, %arg1: i32) -> (i32, i32, i32) {
    %c0_i32 = arith.constant 0 : i32
    %c0_i32_0 = arith.constant 0 : i32
    return %arg0, %arg1, %c0_i32 : i32, i32, i32
  }
  func.func @transform_1(%arg0: i32, %arg1: i32) -> (i32, i32, i32, i32) {
    %c0_i32 = arith.constant 0 : i32
    %c0_i32_0 = arith.constant 0 : i32
    %c0_i32_1 = arith.constant 0 : i32
    return %arg0, %c0_i32, %arg1, %c0_i32_0 : i32, i32, i32, i32
  }
  func.func @transform_2(%arg0: i32, %arg1: i32) -> (i32, i32, i32) {
    %c0_i32 = arith.constant 0 : i32
    %c0_i32_0 = arith.constant 0 : i32
    %c0_i32_1 = arith.constant 0 : i32
    return %arg0, %c0_i32, %c0_i32_0 : i32, i32, i32
  }
  func.func @transform_3(%arg0: i32, %arg1: i32) -> (i32, i32, i32) {
    %c0_i32 = arith.constant 0 : i32
    %c0_i32_0 = arith.constant 0 : i32
    %c0_i32_1 = arith.constant 0 : i32
    return %arg0, %c0_i32, %c0_i32_0 : i32, i32, i32
  }
  func.func @transform_4(%arg0: i32, %arg1: i32) -> (i32, i32, i32) {
    %c0_i32 = arith.constant 0 : i32
    %c0_i32_0 = arith.constant 0 : i32
    return %arg0, %arg1, %c0_i32 : i32, i32, i32
  }
}

</mosaic_0001>

<bundles_post_ra>
// kernel: edge_network_forward.3
= control target key start
LH: loop header
LB: loop body
LE: loop exit
PB: predicated region body
PF: predicated region fallthrough
CT: control target
= control target key end

     0   :  { %9 = vsyncpa [#allocation3], 0  ;;  %s1096_s0 = inlined_call_operand.vmem [shape: f32[2,8,128], index: 0, kind: input, shape index: {}]   ;;  %s1097_s1 = inlined_call_operand.vmem [shape: f32[2,8,8,16], index: 1, kind: input, shape index: {}]   ;;  %s1098_s2 = inlined_call_operand.vmem [shape: f32[2,128,8], index: 2, kind: input, shape index: {}]   ;;  %s1099_s3 = inlined_call_operand.vmem [shape: f32[2,1,16], index: 3, kind: input, shape index: {}]   ;;  %s1100_s4 = inlined_call_operand.hbm [shape: f32[2,8,16], index: 4, kind: output, shape index: {}]  }
   0x1   :  { %11 = vsyncpa [#allocation3 + $0x1], 0  ;;  %s929_s15 = smov 0   ;;  %s931_s16 = smov 0  }
   0x2   :  { %s933_s17 = smov 0   ;;  %s935_s18 = smov 0  }
   0x3   :  { %s937_s19 = smov 0   ;;  %s939_s20 = smov 0  }
   0x4 LB: > { %s612_s21 = sadd.s32 4294967295, %s886_s20   ;;  %s613_s22 = sadd.s32 4294967294, %s886_s20   ;;  %s886_s20 = sphi %s939_s20, %s17_s20   ;;  %s882_s19 = sphi %s937_s19, %s1107_s19   ;;  %s878_s18 = sphi %s935_s18, %s1106_s18   ;;  %s874_s17 = sphi %s933_s17, %s1105_s17   ;;  %s870_s16 = sphi %s931_s16, %s1104_s16   ;;  %s866_s15 = sphi %s929_s15, %s1103_s15  }
   0x5   : > { %s29_s23 = sadd.s32 1, %s882_s19  ;;  %s146_s24 = sadd.s32 1, %s874_s17 }
   0x6   : > { %p31_p0 = scmp.ge.s32.totalorder %s29_s23, 2  ;;  %p156_p1 = scmp.ne.s32.totalorder %s874_s17, %s870_s16 }
   0x7   : > { %p157_p2 = scmp.eq.s32.totalorder %s612_s21, 1  ;;  %p162_p3 = scmp.ne.s32.totalorder %s870_s16, %s866_s15 }
   0x8   : > { %s1109_s23 = smov (%p31_p0, %s29_s23), 0  ;;  %p163_p5 = scmp.eq.s32.totalorder %s613_s22, 1 }
   0x9   : > { %p969_p4 = por %p157_p2, %p156_p1  ;;  %s141_s26 = ssub.s32 %s882_s19, %s1109_s23 }
   0xa   : > { %p616_p6 = scmp.ge.s32.totalorder %s886_s20, 1  ;;  %p144_p7 = scmp.eq.s32.totalorder %s141_s26, 0 }
   0xb   : > { %p976_p8 = por %p163_p5, %p162_p3  ;;  %p216_p9 = scmp.lt.s32.totalorder %s886_s20, 3 }
   0xc   : > { %s982_s28 = scalar_select %p144_p7, %s874_s17, %s146_s24  }
   0xd   : > { %p217_p10 = pnand %p616_p6, %p216_p9 }
   0xe   : > { %s257_s29 = sand.u32 (!%p217_p10), 1, %s870_s16   ;;  %p260_p11 = scmp.lt.s32.totalorder (!%p217_p10), %s878_s18, 1  ;;  %v896_v0 = vmov (!%p217_p10), 0.0|0.0   ;;  %vm897_vm0 = vmmov (!%p217_p10), 0   ;;  %v898_v1 = vmov (!%p217_p10), 0.0   ;;  %v888_v29 = vmov (!%p217_p10), 0.0  }
   0xf   : > { %220 = sbr.rel (%p217_p10) target bundleno = 627 (0x273), region = 36  ;;  %s988_s30 = sshll.u32 (!%p217_p10), %s257_s29, 3  ;;  %695 = vmatprep.subr.bf16.mxu0 (!%p217_p10), %v896_v0  ;;  %685 = vmatprep.mubr.msk.f32.mxu0 (!%p217_p10), %vm897_vm0, %v898_v1 }
  0x10   : > { %s259_s8 = scalar_lea.vmem (!%p217_p10), [#allocation2], %s988_s30  ;;  %s892_s9 = smov (!%p217_p10), 0  }
  0x16   : > { %s991_s5 = scalar_select %p260_p11, %s878_s18, 1 }
  0x18   : > { %s631_s6 = sshll.u32 %s991_s5, 6  ;;  %s632_s7 = sshll.u32 %s991_s5, 7 }
  0x19   : > { %s998_s10 = scalar_lea.vmem %s1097_s1, %s631_s6  ;;  %s1003_s13 = scalar_lea.vmem %s1098_s2, %s632_s7 }
  0x1a   : > { %s282_s22 = scalar_lea.vmem %s1099_s3, %s991_s5  ;;  %v283_v2 = vld [vmem:[%s1003_s13] sm:$0xff]  ;;  %v284_v3 = vld [vmem:[%s1003_s13 + $0x8] sm:$0xff]  ;;  %v285_v4 = vld [vmem:[%s1003_s13 + $0x10] sm:$0xff]  ;;  %s618_s24 = sshll.u32 %s991_s5, 3 }
  0x1b   : > { %v696_v5 = vpack.c.bf16 %v284_v3, %v283_v2  ;;  %v286_v6 = vld [vmem:[%s1003_s13 + $0x18] sm:$0xff]  ;;  %v287_v8 = vld [vmem:[%s1003_s13 + $0x20] sm:$0xff]  ;;  %v288_v9 = vld [vmem:[%s1003_s13 + $0x28] sm:$0xff]  ;;  %s266_s7 = scalar_lea.vmem %s1096_s0, %s618_s24 }
  0x1c   : > { %v699_v7 = vpack.c.bf16 %v286_v6, %v285_v4  ;;  %v702_v10 = vpack.c.bf16 %v288_v9, %v287_v8  ;;  %v289_v11 = vld [vmem:[%s1003_s13 + $0x30] sm:$0xff]  ;;  %v290_v12 = vld [vmem:[%s1003_s13 + $0x38] sm:$0xff]  ;;  %v291_v14 = vld [vmem:[%s1003_s13 + $0x40] sm:$0xff] }
  0x1d   : > { %697 = vmatpush3.bf16.msra.mxu0 %v696_v5  ;;  %v705_v13 = vpack.c.bf16 %v290_v12, %v289_v11  ;;  %v292_v15 = vld [vmem:[%s1003_s13 + $0x48] sm:$0xff]  ;;  %v293_v17 = vld [vmem:[%s1003_s13 + $0x50] sm:$0xff]  ;;  %v294_v18 = vld [vmem:[%s1003_s13 + $0x58] sm:$0xff] }
  0x1e   : > { %698 = vmatprep.subr.bf16.mxu0 %v896_v0  ;;  %v708_v16 = vpack.c.bf16 %v292_v15, %v291_v14  ;;  %v711_v19 = vpack.c.bf16 %v294_v18, %v293_v17  ;;  %v295_v20 = vld [vmem:[%s1003_s13 + $0x60] sm:$0xff]  ;;  %v296_v21 = vld [vmem:[%s1003_s13 + $0x68] sm:$0xff]  ;;  %v297_v23 = vld [vmem:[%s1003_s13 + $0x70] sm:$0xff] }
  0x1f   : > { %v714_v22 = vpack.c.bf16 %v296_v21, %v295_v20  ;;  %v298_v24 = vld [vmem:[%s1003_s13 + $0x78] sm:$0xff]  ;;  %v299_v26 = vld [vmem:[%s266_s7] sm:$0xff] }
  0x20   : > { %v717_v25 = vpack.c.bf16 %v298_v24, %v297_v23 }
  0x21   : > { %700 = vmatpush3.bf16.msra.mxu0 %v699_v7 }
  0x22   : > { %701 = vmatprep.subr.bf16.mxu0 %v896_v0 }
  0x25   : > { %703 = vmatpush3.bf16.msra.mxu0 %v702_v10 }
  0x26   : > { %704 = vmatprep.subr.bf16.mxu0 %v896_v0 }
  0x29   : > { %706 = vmatpush3.bf16.msra.mxu0 %v705_v13 }
  0x2a   : > { %707 = vmatprep.subr.bf16.mxu0 %v896_v0 }
  0x2d   : > { %709 = vmatpush3.bf16.msra.mxu0 %v708_v16 }
  0x2e   : > { %710 = vmatprep.subr.bf16.mxu0 %v896_v0 }
  0x31   : > { %712 = vmatpush3.bf16.msra.mxu0 %v711_v19 }
  0x32   : > { %713 = vmatprep.subr.bf16.mxu0 %v896_v0 }
  0x35   : > { %715 = vmatpush3.bf16.msra.mxu0 %v714_v22 }
  0x36   : > { %716 = vmatprep.subr.bf16.mxu0 %v896_v0 }
  0x39   : > { %718 = vmatpush3.bf16.msra.mxu0 %v717_v25 }
  0x3c   : > { %686 = vmatmul.mubr.f32.vlgmr.msra.gmra.mrb[0].mxu0 %v299_v26 }
 0x10f   : > { %v366_v27 = vpop.f32.mrb[0].mxu0 }
 0x110   : > { %v687_v28 = vpop.f32.mrb[1].mxu0 }
 0x111 LB: >> { %v899_v30 = vmov 0.0|0.0   ;;  %vm900_vm1 = vmmov 0   ;;  %v901_v31 = vmov 0.0   ;;  %s624_s11 = sshll.u32 %s894_s9, 4  ;;  %s623_s12 = sshll.u32 %s894_s9, 3  ;;  %vm384_vm2 = vcmask 130048   ;;  %s894_s9 = sphi %s892_s9, %s375_s9   ;;  %v890_v29 = vphi %v888_v29, %v889_v29  }
 0x112   : >> { %719 = vmatprep.subr.bf16.mxu0 %v899_v30  ;;  %692 = vmatprep.mubr.msk.f32.mxu0 %vm900_vm1, %v901_v31  ;;  %s381_s14 = scalar_lea.vmem %s1003_s13, %s624_s11  ;;  %s378_s21 = scalar_lea.vmem %s998_s10, %s623_s12 }
 0x113   : >> { %v382_v32 = vld [vmem:[%s381_s14] sm:$0xff]  ;;  %v383_v33 = vld [vmem:[%s381_s14 + $0x8] sm:$0xff]  ;;  %s375_s9 = sadd.s32 1, %s894_s9  }
 0x114   : >> { %v720_v34 = vpack.c.bf16 %v383_v33, %v382_v32  ;;  %v379_v35 = vld [vmem:[%s378_s21] sm:$0xff]  ;;  %p372_p12 = scmp.ge.s32.totalorder %s375_s9, 8  }
 0x115   : > { %s902_s24 = smov (%p372_p12), 8   ;;  %vm463_vm3 = vcmask (%p372_p12), 64512   ;;  %v626_v39 = vld [vmem:[%s282_s22] ss:$0 sm:$0xff] (%p372_p12)  ;;  %s628_s7 = sshll.u32 (%p372_p12), %s878_s18, 7 }
 0x116   : >> { %721 = vmatpush3.bf16.msra.mxu0 %v720_v34  ;;  %s490_s11 = sshll.u32 (%p372_p12), %s259_s8, 4  ;;  %s1044_s9 = scalar_lea.hbm (%p372_p12), %s1100_s4, %s628_s7  ;;  %s1046_s11 = int_to_ptr.vmem [resolvable:$true] %s490_s11 }
 0x117   : > { %s476_s18 = scalar_lea.sflag (%p372_p12), [#allocation3], %s257_s29  ;;  %s800_s5 = scalar_lea.vmem (%p372_p12), %s1046_s11, 128 }
 0x118   : > { %p801_p13 = scmp.ne.s32.totalorder (%p372_p12), %s1046_s11, %s800_s5  ;;  %s903_s22 = smov (%p372_p12), [#allocation2]  }
 0x119   : >> { %693 = vmatmul.mubr.msk.f32.vlgmr.msra.gmra.mrb[0].mxu0 %vm384_vm2, %v379_v35  ;;  %s804_s12 = sshll.u32 (%p372_p12), %s903_s22, 4  ;;  %s805_s12 = int_to_ptr.vmem [resolvable:$false] %s804_s12 }
 0x11a   : > { %p802_p0 = pnand (%p372_p12), %p801_p13, %p969_p4  ;;  %s806_s14 = scalar_lea.vmem (%p372_p12), %s805_s12, 256 }
 0x11b   : > { %p807_p2 = scmp.lt.s32.totalorder (%p372_p12), %s1046_s11, %s805_s12  ;;  %p808_p3 = scmp.lt.s32.totalorder (%p372_p12), %s806_s14, %s800_s5 }
 0x11c   : > { %p803_p1 = pneg (%p372_p12), %p802_p0 }
 0x11d   : > { %p809_p5 = por (%p372_p12), %p808_p3, %p807_p2 }
 0x11f   : > { %p810_p6 = pnand (%p372_p12), %p809_p5, %p803_p1 }
 0x1e9   : > { %374 = sbr.rel (!%p372_p12) target bundleno = 273 (0x111), region = 89 }
 0x1ec   : >> { %v454_v36 = vpop.f32.mrb[0].mxu0 }
 0x1ed   : >> { %v458_v37 = vadd.f32 %v890_v29, %v454_v36   ;;  %v694_v38 = vpop.f32.mrb[1].mxu0 }
 0x1ef   : >> { %v889_v29 = vmov %v458_v37   ;;  %460 = vrot.lane.b32.xlu0 (%p372_p12), %v458_v37, %s902_s24 }
 0x261   : > { %v461_v40 = vpop.permute.xlu0 %460 }
 0x262   : > { %v464_v41 = vsel %vm463_vm3, %v366_v27, %v461_v40 }
 0x263   : > { %v472_v42 = vadd.f32 %v626_v39, %v464_v41 }
 0x265   : > { %474 = vst.msk [vmem:[%s259_s8] sm:$0xff] %vm384_vm2, %v472_v42 }
 0x266   : > { %813 = shalt.err (!%p810_p6)
}
 0x267   : > { %s814_s29 = scalar_lea.hbm %s1044_s9, 128  ;;  %s818_s21 = scalar_lea.hbm %s1100_s4, 256 }
 0x268   : > { %p815_p7 = scmp.ne.s32.totalorder %s1044_s9, %s814_s29  ;;  %p819_p11 = scmp.lt.u32.totalorder %s1044_s9, %s1100_s4 }
 0x269   : > { %p820_p12 = scmp.lt.u32.totalorder %s818_s21, %s814_s29  ;;  %p822_p0 = scmp.lt.u32.totalorder %s814_s29, %s1044_s9 }
 0x26a   : > { %p816_p9 = pnand %p815_p7, %p969_p4 }
 0x26b   : > { %p821_p13 = por %p820_p12, %p819_p11 }
 0x26c   : > { %p817_p10 = pneg %p816_p9 }
 0x26d   : > { %p823_p1 = por %p822_p0, %p821_p13 }
 0x26f   : > { %p824_p2 = pnand %p823_p1, %p817_p10 }
 0x271   : > { %827 = shalt.err (!%p824_p2)
}
 0x272   : > { %722 = dma.vmem_to_hbm [thread:$0]  (%p969_p4), %s1046_s11, 128, %s1044_s9, %s476_s18  }
 0x273 PF: > { %p728_p3 = scmp.ge.s32.totalorder %s886_s20, 2  ;;  %s502_s6 = sand.u32 1, %s866_s15  }
 0x274   : > { %s503_s7 = scalar_lea.sflag [#allocation3], %s502_s6 }
 0x275   : > { %p725_p5 = pnand %p728_p3, %p976_p8 }
 0x277   : > { %861 = dma.done.wait (!%p725_p5), %s503_s7, 128  }
 0x278   : > { %863 = vsyncadd (!%p725_p5), %s503_s7, 4294967168  ;;  %s17_s20 = sadd.s32 1, %s886_s20   ;;  %s1103_s15 = smov %s870_s16 }
 0x279   : > { %p14_p6 = scmp.ge.s32.totalorder %s17_s20, 4   ;;  %s1104_s16 = smov %s874_s17 }
 0x27a   : > { %s1105_s17 = smov %s982_s28  ;;  %s1106_s18 = smov %s882_s19 }
 0x27b   : > { %s1107_s19 = smov %s1109_s23  ;;  %16 = sbr.rel (!%p14_p6) target bundleno = 4 (0x4), region = 100 }
 0x282   :  { %508 = vsyncpa [#allocation3], 1 }
 0x283   :  { %510 = vsyncpa [#allocation3 + $0x1], 1 }

// kernel: edge_network_forward.2
= control target key start
LH: loop header
LB: loop body
LE: loop exit
PB: predicated region body
PF: predicated region fallthrough
CT: control target
= control target key end

     0   :  { %v1970_v0 = vmov 0   ;;  %v1971_v8 = vmov 0.0   ;;  %s2633_s1 = inlined_call_operand.vmem [shape: f32[128,1], index: 1, kind: input, shape index: {}]   ;;  %s2634_s0 = inlined_call_operand.vmem [shape: s32[128,1], index: 0, kind: input, shape index: {}]   ;;  %s2635_s4 = inlined_call_operand.vmem [shape: f32[16,16], index: 4, kind: input, shape index: {}]   ;;  %s2636_s2 = inlined_call_operand.vmem [shape: f32[5,16], index: 2, kind: input, shape index: {}]   ;;  %s2637_s3 = inlined_call_operand.vmem [shape: f32[1,16], index: 3, kind: input, shape index: {}]   ;;  %s2638_s6 = inlined_call_operand.vmem [shape: f32[16,16], index: 6, kind: input, shape index: {}]   ;;  %s2639_s5 = inlined_call_operand.vmem [shape: f32[1,16], index: 5, kind: input, shape index: {}]   ;;  %s2640_s8 = inlined_call_operand.vmem [shape: f32[16,16], index: 8, kind: input, shape index: {}]   ;;  %s2641_s7 = inlined_call_operand.vmem [shape: f32[1,16], index: 7, kind: input, shape index: {}]   ;;  %s2642_s9 = inlined_call_operand.vmem [shape: f32[1,16], index: 9, kind: input, shape index: {}]   ;;  %s2643_s10 = inlined_call_operand.vmem [shape: f32[128,16], index: 10, kind: output, shape index: {}]  }
   0x1   :  { %1809 = vset.pattern.permute.xlu1 %v1970_v0  ;;  %1808 = vset.pattern.permute.xlu0 %v1970_v0  ;;  %v53_v1 = vld [vmem:[%s2633_s1 + $0x10] sm:$0xff]  ;;  %v51_v2 = vld [vmem:[%s2633_s1] sm:$0xff]  ;;  %v52_v3 = vld [vmem:[%s2633_s1 + $0x8] sm:$0xff] }
   0x2   :  { %81 = vperm.xlu1 %1809, %v53_v1   ;;  %71 = vperm.xlu0 %1808, %v51_v2   ;;  %v35_v4 = vld [vmem:[%s2634_s0] sm:$0xff]  ;;  %v36_v5 = vld [vmem:[%s2634_s0 + $0x8] sm:$0xff]  ;;  %v2045_v6 = vld [vmem:[%s2634_s0 + $0x10] sm:$0xff] }
   0x3   :  { %vm191_vm0 = vcmp.eq.s32.totalorder %v35_v4, 0  ;;  %vm192_vm1 = vcmp.eq.s32.totalorder %v36_v5, 0  ;;  %vm355_vm2 = vcmp.eq.s32.totalorder %v35_v4, 1  ;;  %vm356_vm3 = vcmp.eq.s32.totalorder %v36_v5, 1  ;;  %v2050_v7 = vld [vmem:[%s2634_s0 + $0x18] sm:$0xff]  ;;  %v39_v24 = vld [vmem:[%s2634_s0 + $0x20] sm:$0xff] }
   0x4   :  { %v1539_v9 = vsel %vm191_vm0, 1.0, %v1971_v8  ;;  %v1540_v10 = vsel %vm192_vm1, 1.0, %v1971_v8  ;;  %v1555_v11 = vsel %vm355_vm2, 1.0, %v1971_v8  ;;  %v1556_v12 = vsel %vm356_vm3, 1.0, %v1971_v8  ;;  %v54_v17 = vld [vmem:[%s2633_s1 + $0x18] sm:$0xff]  ;;  %v2075_v25 = vld [vmem:[%s2634_s0 + $0x28] sm:$0xff] }
   0x5   :  { %v1810_v13 = vpack.i.bf16 %v1540_v10, %v1539_v9  ;;  %vm193_vm4 = vcmp.eq.s32.totalorder %v2045_v6, 0  ;;  %vm519_vm5 = vcmp.eq.s32.totalorder %v35_v4, 2  ;;  %v1815_v14 = vpack.i.bf16 %v1556_v12, %v1555_v11  ;;  %v55_v26 = vld [vmem:[%s2633_s1 + $0x20] sm:$0xff]  ;;  %v56_v31 = vld [vmem:[%s2633_s1 + $0x28] sm:$0xff]  ;;  %v2095_v36 = vld [vmem:[%s2634_s0 + $0x30] sm:$0xff] }
   0x6   :  { %76 = vperm.xlu0 %1808, %v52_v3   ;;  %vm194_vm6 = vcmp.eq.s32.totalorder %v2050_v7, 0  ;;  %vm520_vm7 = vcmp.eq.s32.totalorder %v36_v5, 2  ;;  %v1541_v15 = vsel %vm193_vm4, 1.0, %v1971_v8  ;;  %v1571_v16 = vsel %vm519_vm5, 1.0, %v1971_v8  ;;  %v2100_v37 = vld [vmem:[%s2634_s0 + $0x38] sm:$0xff]  ;;  %v2128_v48 = vld [vmem:[%s2634_s0 + $0x60] sm:$0xff] }
   0x7   :  { %1811 = vperm.xlu1 %1809, %v1810_v13   ;;  %v1542_v18 = vsel %vm194_vm6, 1.0, %v1971_v8  ;;  %v1572_v19 = vsel %vm520_vm7, 1.0, %v1971_v8  ;;  %vm357_vm8 = vcmp.eq.s32.totalorder %v2045_v6, 1  ;;  %vm683_vm9 = vcmp.eq.s32.totalorder %v35_v4, 3  ;;  %v57_v49 = vld [vmem:[%s2633_s1 + $0x30] sm:$0xff]  ;;  %v2144_v53 = vld [vmem:[%s2634_s0 + $0x68] sm:$0xff] }
   0x8   :  { %v1820_v20 = vpack.i.bf16 %v1571_v16, %v1541_v15  ;;  %v1825_v21 = vpack.i.bf16 %v1572_v19, %v1542_v18  ;;  %v1557_v22 = vsel %vm357_vm8, 1.0, %v1971_v8  ;;  %v1587_v23 = vsel %vm683_vm9, 1.0, %v1971_v8  ;;  %v2153_v57 = vld [vmem:[%s2634_s0 + $0x40] sm:$0xff]  ;;  %v2158_v58 = vld [vmem:[%s2634_s0 + $0x50] sm:$0xff]  ;;  %v2169_v61 = vld [vmem:[%s2634_s0 + $0x48] sm:$0xff] }
   0x9   :  { %vm358_vm10 = vcmp.eq.s32.totalorder %v2050_v7, 1  ;;  %vm684_vm11 = vcmp.eq.s32.totalorder %v36_v5, 3  ;;  %v1830_v27 = vpack.i.bf16 %v1587_v23, %v1557_v22  ;;  %vm195_vm12 = vcmp.eq.s32.totalorder %v39_v24, 0  ;;  %v2174_v62 = vld [vmem:[%s2634_s0 + $0x58] sm:$0xff]  ;;  %v49_v3 = vld [vmem:[%s2634_s0 + $0x70] sm:$0xff]  ;;  %v59_v23 = vld [vmem:[%s2633_s1 + $0x40] sm:$0xff] }
   0xa   :  { %1816 = vperm.xlu0 %1808, %v1815_v14   ;;  %v1558_v28 = vsel %vm358_vm10, 1.0, %v1971_v8  ;;  %v1588_v29 = vsel %vm684_vm11, 1.0, %v1971_v8  ;;  %vm521_vm13 = vcmp.eq.s32.totalorder %v2045_v6, 2  ;;  %vm196_vm14 = vcmp.eq.s32.totalorder %v2075_v25, 0  ;;  %v58_v0 = vld [vmem:[%s2633_s1 + $0x38] sm:$0xff] }
   0xb   :  { %86 = vperm.xlu1 %1809, %v54_v17   ;;  %vm522_vm15 = vcmp.eq.s32.totalorder %v2050_v7, 2  ;;  %v1543_v30 = vsel %vm195_vm12, 1.0, %v1971_v8  ;;  %v1835_v32 = vpack.i.bf16 %v1588_v29, %v1558_v28  ;;  %v1573_v33 = vsel %vm521_vm13, 1.0, %v1971_v8  ;;  %v50_v10 = vld [vmem:[%s2634_s0 + $0x78] sm:$0xff] }
   0xc   :  { %v1544_v34 = vsel %vm196_vm14, 1.0, %v1971_v8  ;;  %v1574_v35 = vsel %vm522_vm15, 1.0, %v1971_v8  ;;  %vm359_vm0 = vcmp.eq.s32.totalorder %v39_v24, 1  ;;  %vm685_vm1 = vcmp.eq.s32.totalorder %v2045_v6, 3 }
   0xd   :  { %v1840_v38 = vpack.i.bf16 %v1573_v33, %v1543_v30  ;;  %v1845_v39 = vpack.i.bf16 %v1574_v35, %v1544_v34  ;;  %vm360_vm2 = vcmp.eq.s32.totalorder %v2075_v25, 1  ;;  %vm686_vm3 = vcmp.eq.s32.totalorder %v2050_v7, 3 }
   0xe   :  { %1821 = vperm.xlu0 %1808, %v1820_v20   ;;  %vm197_vm4 = vcmp.eq.s32.totalorder %v2095_v36, 0  ;;  %vm523_vm5 = vcmp.eq.s32.totalorder %v39_v24, 2  ;;  %vm198_vm6 = vcmp.eq.s32.totalorder %v2100_v37, 0  ;;  %vm524_vm7 = vcmp.eq.s32.totalorder %v2075_v25, 2 }
   0xf   :  { %1826 = vperm.xlu1 %1809, %v1825_v21   ;;  %v1559_v40 = vsel %vm359_vm0, 1.0, %v1971_v8  ;;  %v1589_v41 = vsel %vm685_vm1, 1.0, %v1971_v8  ;;  %vm361_vm8 = vcmp.eq.s32.totalorder %v2095_v36, 1  ;;  %vm687_vm9 = vcmp.eq.s32.totalorder %v39_v24, 3 }
  0x10   :  { %v1560_v42 = vsel %vm360_vm2, 1.0, %v1971_v8  ;;  %v1590_v43 = vsel %vm686_vm3, 1.0, %v1971_v8  ;;  %v2114_v44 = vsel %vm197_vm4, 1.0, %v1971_v8  ;;  %v2117_v45 = vsel %vm523_vm5, 1.0, %v1971_v8 }
  0x11   :  { %v2120_v46 = vsel %vm198_vm6, 1.0, %v1971_v8  ;;  %v2123_v47 = vsel %vm524_vm7, 1.0, %v1971_v8  ;;  %v1850_v50 = vpack.i.bf16 %v1589_v41, %v1559_v40  ;;  %v2134_v51 = vsel %vm361_vm8, 1.0, %v1971_v8 }
  0x12   :  { %91 = vperm.xlu0 %1808, %v55_v26   ;;  %v2137_v52 = vsel %vm687_vm9, 1.0, %v1971_v8  ;;  %vm362_vm10 = vcmp.eq.s32.totalorder %v2100_v37, 1  ;;  %vm688_vm11 = vcmp.eq.s32.totalorder %v2075_v25, 3  ;;  %v1855_v54 = vpack.i.bf16 %v1590_v43, %v1560_v42 }
  0x13   :  { %1831 = vperm.xlu1 %1809, %v1830_v27   ;;  %v1860_v55 = vpack.i.bf16 %v2117_v45, %v2114_v44  ;;  %v1865_v56 = vpack.i.bf16 %v2123_v47, %v2120_v46  ;;  %vm203_vm12 = vcmp.eq.s32.totalorder %v2128_v48, 0  ;;  %v1870_v59 = vpack.i.bf16 %v2137_v52, %v2134_v51 }
  0x14   :  { %v2164_v60 = vsel %vm362_vm10, 1.0, %v1971_v8  ;;  %v2177_v63 = vsel %vm203_vm12, 1.0, %v1971_v8  ;;  %vm529_vm13 = vcmp.eq.s32.totalorder %v2158_v58, 2  ;;  %v2186_v1 = vsel %vm688_vm11, 1.0, %v1971_v8 }
  0x15   :  { %v2189_v2 = vsel %vm529_vm13, 1.0, %v1971_v8  ;;  %vm204_vm14 = vcmp.eq.s32.totalorder %v2144_v53, 0  ;;  %vm530_vm15 = vcmp.eq.s32.totalorder %v2174_v62, 2  ;;  %vm199_vm0 = vcmp.eq.s32.totalorder %v2153_v57, 0 }
  0x16   :  { %96 = vperm.xlu0 %1808, %v56_v31   ;;  %vm525_vm1 = vcmp.eq.s32.totalorder %v2095_v36, 2  ;;  %v1920_v4 = vpack.i.bf16 %v2189_v2, %v2177_v63  ;;  %v2201_v5 = vsel %vm204_vm14, 1.0, %v1971_v8  ;;  %v2204_v6 = vsel %vm530_vm15, 1.0, %v1971_v8  ;;  %v863_v31 = vld [vmem:[%s2635_s4] sm:$0xff] }
  0x17   :  { %1836 = vperm.xlu1 %1809, %v1835_v32   ;;  %vm367_vm2 = vcmp.eq.s32.totalorder %v2128_v48, 1  ;;  %vm200_vm3 = vcmp.eq.s32.totalorder %v2169_v61, 0  ;;  %vm526_vm4 = vcmp.eq.s32.totalorder %v2100_v37, 2  ;;  %v1925_v7 = vpack.i.bf16 %v2204_v6, %v2201_v5  ;;  %v864_v32 = vld [vmem:[%s2635_s4 + $0x8] sm:$0xff] }
  0x18   :  { %v2212_v9 = vsel %vm367_vm2, 1.0, %v1971_v8  ;;  %vm693_vm5 = vcmp.eq.s32.totalorder %v2158_v58, 3  ;;  %vm368_vm6 = vcmp.eq.s32.totalorder %v2144_v53, 1  ;;  %vm694_vm7 = vcmp.eq.s32.totalorder %v2174_v62, 3 }
  0x19   :  { %v2220_v11 = vsel %vm693_vm5, 1.0, %v1971_v8  ;;  %v2223_v12 = vsel %vm368_vm6, 1.0, %v1971_v8  ;;  %vm205_vm8 = vcmp.eq.s32.totalorder %v49_v3, 0  ;;  %v2229_v14 = vsel %vm694_vm7, 1.0, %v1971_v8 }
  0x1a   :  { %1841 = vperm.xlu0 %1808, %v1840_v38   ;;  %v1930_v13 = vpack.i.bf16 %v2220_v11, %v2212_v9  ;;  %v2232_v15 = vsel %vm205_vm8, 1.0, %v1971_v8  ;;  %vm531_vm9 = vcmp.eq.s32.totalorder %v2128_v48, 2  ;;  %v1935_v16 = vpack.i.bf16 %v2229_v14, %v2223_v12  ;;  %v60_v38 = vld [vmem:[%s2633_s1 + $0x48] sm:$0xff] }
  0x1b   :  { %1846 = vperm.xlu1 %1809, %v1845_v39   ;;  %v2238_v17 = vsel %vm531_vm9, 1.0, %v1971_v8  ;;  %vm206_vm10 = vcmp.eq.s32.totalorder %v50_v10, 0  ;;  %vm532_vm11 = vcmp.eq.s32.totalorder %v2144_v53, 2  ;;  %vm369_vm12 = vcmp.eq.s32.totalorder %v49_v3, 1 }
  0x1c   :  { %v1940_v18 = vpack.i.bf16 %v2238_v17, %v2232_v15  ;;  %v2244_v19 = vsel %vm206_vm10, 1.0, %v1971_v8  ;;  %v2247_v20 = vsel %vm532_vm11, 1.0, %v1971_v8  ;;  %v2252_v22 = vsel %vm369_vm12, 1.0, %v1971_v8 }
  0x1d   :  { %v1945_v21 = vpack.i.bf16 %v2247_v20, %v2244_v19  ;;  %vm695_vm13 = vcmp.eq.s32.totalorder %v2128_v48, 3  ;;  %vm370_vm14 = vcmp.eq.s32.totalorder %v50_v10, 1  ;;  %vm696_vm15 = vcmp.eq.s32.totalorder %v2144_v53, 3 }
  0x1e   :  { %101 = vperm.xlu0 %1808, %v57_v49   ;;  %v2259_v24 = vsel %vm695_vm13, 1.0, %v1971_v8  ;;  %v2262_v25 = vsel %vm370_vm14, 1.0, %v1971_v8  ;;  %vm533_vm2 = vcmp.eq.s32.totalorder %v49_v3, 2  ;;  %v2268_v27 = vsel %vm696_vm15, 1.0, %v1971_v8 }
  0x1f   :  { %1851 = vperm.xlu1 %1809, %v1850_v50   ;;  %v1950_v26 = vpack.i.bf16 %v2259_v24, %v2252_v22  ;;  %vm534_vm5 = vcmp.eq.s32.totalorder %v50_v10, 2  ;;  %v2271_v28 = vsel %vm533_vm2, 1.0, %v1971_v8  ;;  %v1955_v29 = vpack.i.bf16 %v2268_v27, %v2262_v25  ;;  %v2399_v24 = vld [vmem:[%s2637_s3] ss:$0 sm:$0xff] }
  0x20   :  { %v2276_v30 = vsel %vm534_vm5, 1.0, %v1971_v8  ;;  %vm697_vm6 = vcmp.eq.s32.totalorder %v49_v3, 3  ;;  %vm698_vm7 = vcmp.eq.s32.totalorder %v50_v10, 3  ;;  %v1875_v39 = vpack.i.bf16 %v2186_v1, %v2164_v60 }
  0x21   :  { %v1960_v33 = vpack.i.bf16 %v2276_v30, %v2271_v28  ;;  %v2287_v34 = vsel %vm697_vm6, 1.0, %v1971_v8  ;;  %v2290_v35 = vsel %vm698_vm7, 1.0, %v1971_v8  ;;  %v1547_v40 = vsel %vm199_vm0, 1.0, %v1971_v8 }
  0x22   :  { %106 = vperm.xlu0 %1808, %v58_v0   ;;  %v1577_v41 = vsel %vm525_vm1, 1.0, %v1971_v8  ;;  %v1965_v42 = vpack.i.bf16 %v2290_v35, %v2287_v34  ;;  %v1548_v43 = vsel %vm200_vm3, 1.0, %v1971_v8  ;;  %v1578_v44 = vsel %vm526_vm4, 1.0, %v1971_v8 }
  0x23   :  { %1856 = vperm.xlu1 %1809, %v1855_v54   ;;  %v1792_v45 = vpack.c.bf16 %v864_v32, %v863_v31  ;;  %vm363_vm8 = vcmp.eq.s32.totalorder %v2153_v57, 1  ;;  %vm689_vm0 = vcmp.eq.s32.totalorder %v2095_v36, 3  ;;  %v1880_v46 = vpack.i.bf16 %v1577_v41, %v1547_v40  ;;  %v61_v36 = vld [vmem:[%s2633_s1 + $0x50] sm:$0xff]  ;;  %v64_v31 = vld [vmem:[%s2633_s1 + $0x68] sm:$0xff] }
  0x24   :  { %v1885_v47 = vpack.i.bf16 %v1578_v44, %v1548_v43  ;;  %v1563_v48 = vsel %vm363_vm8, 1.0, %v1971_v8  ;;  %v1593_v49 = vsel %vm689_vm0, 1.0, %v1971_v8  ;;  %vm364_vm1 = vcmp.eq.s32.totalorder %v2169_v61, 1 }
  0x25   :  { %1793 = vmatprep.subr.bf16.mxu0 %v1792_v45  ;;  %1804 = vmatprep.subr.bf16.mxu1 %v1792_v45  ;;  %vm690_vm3 = vcmp.eq.s32.totalorder %v2100_v37, 3  ;;  %v1890_v50 = vpack.i.bf16 %v1593_v49, %v1563_v48  ;;  %v1564_v51 = vsel %vm364_vm1, 1.0, %v1971_v8  ;;  %vm201_vm4 = vcmp.eq.s32.totalorder %v2158_v58, 0  ;;  %v62_v37 = vld [vmem:[%s2633_s1 + $0x58] sm:$0xff] }
  0x26   :  { %1861 = vperm.xlu0 %1808, %v1860_v55   ;;  %1795 = vmatpush3.bf16.msra.mxu0 %v1792_v45  ;;  %v1594_v52 = vsel %vm690_vm3, 1.0, %v1971_v8  ;;  %vm527_vm9 = vcmp.eq.s32.totalorder %v2153_v57, 2  ;;  %vm202_vm10 = vcmp.eq.s32.totalorder %v2174_v62, 0  ;;  %vm528_vm11 = vcmp.eq.s32.totalorder %v2169_v61, 2 }
  0x27   :  { %1866 = vperm.xlu1 %1809, %v1865_v56   ;;  %1805 = vmatpush3.bf16.msra.mxu1 %v1792_v45  ;;  %v1895_v53 = vpack.i.bf16 %v1594_v52, %v1564_v51  ;;  %v1549_v54 = vsel %vm201_vm4, 1.0, %v1971_v8  ;;  %v1579_v55 = vsel %vm527_vm9, 1.0, %v1971_v8  ;;  %v1550_v56 = vsel %vm202_vm10, 1.0, %v1971_v8 }
  0x28   :  { %vm365_vm12 = vcmp.eq.s32.totalorder %v2158_v58, 1  ;;  %vm691_vm13 = vcmp.eq.s32.totalorder %v2153_v57, 3  ;;  %v1900_v60 = vpack.i.bf16 %v1579_v55, %v1549_v54  ;;  %vm366_vm14 = vcmp.eq.s32.totalorder %v2174_v62, 1  ;;  %v63_v58 = vld [vmem:[%s2633_s1 + $0x60] sm:$0xff] }
  0x29   :  { %v1565_v1 = vsel %vm365_vm12, 1.0, %v1971_v8  ;;  %v1595_v3 = vsel %vm691_vm13, 1.0, %v1971_v8  ;;  %vm692_vm15 = vcmp.eq.s32.totalorder %v2169_v61, 3  ;;  %v1566_v57 = vsel %vm366_vm14, 1.0, %v1971_v8  ;;  %v66_v61 = vld [vmem:[%s2633_s1 + $0x78] sm:$0xff] }
  0x2a   :  { %111 = vperm.xlu0 %1808, %v59_v23   ;;  %v1910_v10 = vpack.i.bf16 %v1595_v3, %v1565_v1  ;;  %v1596_v23 = vsel %vm692_vm15, 1.0, %v1971_v8  ;;  %v149_v63 = vlaneseq  ;;  %vm872_vm2 = vcmask 130048  }
  0x2b   :  { %1871 = vperm.xlu1 %1809, %v1870_v59   ;;  %v1580_v59 = vsel %vm528_vm11, 1.0, %v1971_v8  ;;  %v1915_v62 = vpack.i.bf16 %v1596_v23, %v1566_v57  ;;  %v65_v8 = vld [vmem:[%s2633_s1 + $0x70] sm:$0xff] }
  0x2c   :  { %v1905_v0 = vpack.i.bf16 %v1580_v59, %v1550_v56  ;;  %v150_v2 = vshrl.u32 %v149_v63, 7 }
  0x2e   :  { %116 = vperm.xlu0 %1808, %v60_v38   ;;  %v151_v6 = vsub.s32 4, %v150_v2  ;;  %v321_v11 = vsub.s32 0, %v150_v2  ;;  %v485_v14 = vsub.s32 1, %v150_v2  ;;  %v813_v30 = vsub.s32 3, %v150_v2 }
  0x2f   :  { %1876 = vperm.xlu1 %1809, %v1875_v39  }
  0x32   :  { %1881 = vperm.xlu0 %1808, %v1880_v46  }
  0x33   :  { %1886 = vperm.xlu1 %1809, %v1885_v47  }
  0x36   :  { %121 = vperm.xlu0 %1808, %v61_v36  }
  0x37   :  { %1891 = vperm.xlu1 %1809, %v1890_v50  }
  0x3a   :  { %126 = vperm.xlu0 %1808, %v62_v37  }
  0x3b   :  { %1896 = vperm.xlu1 %1809, %v1895_v53  }
  0x3e   :  { %1901 = vperm.xlu0 %1808, %v1900_v60  }
  0x3f   :  { %1906 = vperm.xlu1 %1809, %v1905_v0  }
  0x42   :  { %131 = vperm.xlu0 %1808, %v63_v58  }
  0x43   :  { %1911 = vperm.xlu1 %1809, %v1910_v10  }
  0x46   :  { %136 = vperm.xlu0 %1808, %v64_v31  }
  0x47   :  { %1916 = vperm.xlu1 %1809, %v1915_v62  }
  0x4a   :  { %1921 = vperm.xlu0 %1808, %v1920_v4  }
  0x4b   :  { %1926 = vperm.xlu1 %1809, %v1925_v7   ;;  %v67_v7 = vld [vmem:[%s2636_s2] sm:$0x1f] }
  0x4c   :  { %v2391_v15 = vrot.slane %v67_v7, %v321_v11  ;;  %v2410_v45 = vrot.slane %v67_v7, %v813_v30 }
  0x4e   :  { %141 = vperm.xlu0 %1808, %v65_v8  }
  0x4f   :  { %1931 = vperm.xlu1 %1809, %v1930_v13   ;;  %v2389_v13 = vrot.slane %v67_v7, %v151_v6 }
  0x52   :  { %146 = vperm.xlu0 %1808, %v66_v61  }
  0x53   :  { %1936 = vperm.xlu1 %1809, %v1935_v16  }
  0x56   :  { %1941 = vperm.xlu0 %1808, %v1940_v18   ;;  %v649_v18 = vsub.s32 2, %v150_v2 }
  0x57   :  { %1946 = vperm.xlu1 %1809, %v1945_v21   ;;  %v2394_v21 = vrot.slane %v67_v7, %v485_v14 }
  0x58   :  { %v2403_v28 = vrot.slane %v67_v7, %v649_v18 }
  0x5a   :  { %1951 = vperm.xlu0 %1808, %v1950_v26  }
  0x5b   :  { %1956 = vperm.xlu1 %1809, %v1955_v29  }
  0x5e   :  { %1961 = vperm.xlu0 %1808, %v1960_v33  }
  0x5f   :  { %1966 = vperm.xlu1 %1809, %v1965_v42  }
  0x81   :  { %v82_v4 = vpop.permute.xlu1 %81  ;;  %v72_v5 = vpop.permute.xlu0 %71 }
  0x82   :  { %v153_v20 = vmul.f32 %v2389_v13, %v72_v5  ;;  %v155_v54 = vmul.f32 %v2389_v13, %v82_v4 }
  0x84   :  { %v175_v34 = vadd.f32 %v2399_v24, %v153_v20  ;;  %v177_v61 = vadd.f32 %v2399_v24, %v155_v54 }
  0x85   :  { %v77_v9 = vpop.permute.xlu0 %76 }
  0x86   :  { %v1812_v12 = vpop.permute.xlu1 %1811  ;;  %v154_v25 = vmul.f32 %v2389_v13, %v77_v9 }
  0x87   :  { %v1813_v16 = vunpack.i.l.bf16 %v1812_v12  ;;  %v1814_v26 = vunpack.i.h.bf16 %v1812_v12 }
  0x88   :  { %v176_v39 = vadd.f32 %v2399_v24, %v154_v25 }
  0x89   :  { %v1817_v17 = vpop.permute.xlu0 %1816  ;;  %v323_v27 = vmul.f32 %v1813_v16, %v2391_v15  ;;  %v324_v40 = vmul.f32 %v1814_v26, %v2391_v15 }
  0x8a   :  { %v87_v19 = vpop.permute.xlu1 %86  ;;  %v1818_v22 = vunpack.i.l.bf16 %v1817_v17  ;;  %v1819_v35 = vunpack.i.h.bf16 %v1817_v17 }
  0x8b   :  { %v339_v41 = vadd.f32 %v323_v27, %v175_v34  ;;  %v340_v36 = vadd.f32 %v324_v40, %v176_v39  ;;  %v156_v31 = vmul.f32 %v2389_v13, %v87_v19 }
  0x8c   :  { %v487_v38 = vmul.f32 %v1818_v22, %v2394_v21  ;;  %v488_v47 = vmul.f32 %v1819_v35, %v2394_v21 }
  0x8d   :  { %v1822_v29 = vpop.permute.xlu0 %1821  ;;  %v178_v14 = vadd.f32 %v2399_v24, %v156_v31 }
  0x8e   :  { %v1824_v32 = vunpack.i.h.bf16 %v1822_v29  ;;  %v1827_v33 = vpop.permute.xlu1 %1826  ;;  %v503_v48 = vadd.f32 %v487_v38, %v339_v41  ;;  %v1823_v50 = vunpack.i.l.bf16 %v1822_v29  ;;  %v504_v56 = vadd.f32 %v488_v47, %v340_v36 }
  0x8f   :  { %v1829_v43 = vunpack.i.h.bf16 %v1827_v33  ;;  %v1828_v1 = vunpack.i.l.bf16 %v1827_v33 }
  0x90   :  { %v651_v42 = vmul.f32 %v1824_v32, %v2403_v28  ;;  %v325_v3 = vmul.f32 %v1823_v50, %v2391_v15 }
  0x91   :  { %v92_v44 = vpop.permute.xlu0 %91  ;;  %v652_v51 = vmul.f32 %v1829_v43, %v2403_v28  ;;  %v326_v5 = vmul.f32 %v1828_v1, %v2391_v15 }
  0x92   :  { %v1832_v46 = vpop.permute.xlu1 %1831  ;;  %v667_v53 = vadd.f32 %v651_v42, %v503_v48  ;;  %v341_v6 = vadd.f32 %v325_v3, %v177_v61  ;;  %v157_v30 = vmul.f32 %v2389_v13, %v92_v44 }
  0x93   :  { %v1834_v49 = vunpack.i.h.bf16 %v1832_v46  ;;  %v1833_v59 = vunpack.i.l.bf16 %v1832_v46  ;;  %v668_v58 = vadd.f32 %v652_v51, %v504_v56  ;;  %v342_v20 = vadd.f32 %v326_v5, %v178_v14 }
  0x94   :  { %v179_v36 = vadd.f32 %v2399_v24, %v157_v30 }
  0x95   :  { %v815_v52 = vmul.f32 %v1834_v49, %v2410_v45  ;;  %v97_v37 = vpop.permute.xlu0 %96  ;;  %v489_v63 = vmul.f32 %v1833_v59, %v2394_v21 }
  0x96   :  { %v1837_v55 = vpop.permute.xlu1 %1836  ;;  %v158_v47 = vmul.f32 %v2389_v13, %v97_v37 }
  0x97   :  { %v1839_v60 = vunpack.i.h.bf16 %v1837_v55  ;;  %v831_v0 = vadd.f32 %v815_v52, %v667_v53  ;;  %v1838_v2 = vunpack.i.l.bf16 %v1837_v55  ;;  %v505_v17 = vadd.f32 %v489_v63, %v341_v6 }
  0x98   :  { %v180_v37 = vadd.f32 %v2399_v24, %v158_v47 }
  0x99   :  { %v816_v10 = vmul.f32 %v1839_v60, %v2410_v45  ;;  %v1842_v57 = vpop.permute.xlu0 %1841  ;;  %v847_v23 = vmax.f32 %v831_v0, 0.0  ;;  %v490_v18 = vmul.f32 %v1838_v2, %v2394_v21 }
  0x9a   :  { %v1844_v62 = vunpack.i.h.bf16 %v1842_v57  ;;  %v1847_v8 = vpop.permute.xlu1 %1846  ;;  %v1843_v22 = vunpack.i.l.bf16 %v1842_v57 }
  0x9b   :  { %v832_v4 = vadd.f32 %v816_v10, %v668_v58  ;;  %1712 = vmatprep.mubr.msk.f32.mxu0 %vm872_vm2, %v847_v23  ;;  %v1849_v11 = vunpack.i.h.bf16 %v1847_v8  ;;  %v506_v33 = vadd.f32 %v490_v18, %v342_v20  ;;  %v1848_v39 = vunpack.i.l.bf16 %v1847_v8 }
  0x9c   :  { %v653_v9 = vmul.f32 %v1844_v62, %v2403_v28  ;;  %v327_v40 = vmul.f32 %v1843_v22, %v2391_v15 }
  0x9d   :  { %v848_v7 = vmax.f32 %v832_v4, 0.0  ;;  %v102_v12 = vpop.permute.xlu0 %101  ;;  %v654_v26 = vmul.f32 %v1849_v11, %v2403_v28  ;;  %v328_v52 = vmul.f32 %v1848_v39, %v2391_v15 }
  0x9e   :  { %v1852_v16 = vpop.permute.xlu1 %1851  ;;  %v669_v25 = vadd.f32 %v653_v9, %v505_v17  ;;  %v343_v53 = vadd.f32 %v327_v40, %v179_v36  ;;  %v159_v8 = vmul.f32 %v2389_v13, %v102_v12 }
  0x9f   :  { %v1854_v19 = vunpack.i.h.bf16 %v1852_v16  ;;  %1713 = vmatmul.mubr.msk.f32.vlgmr.msra.gmra.mrb[0].mxu0 %vm872_vm2, %v848_v7  ;;  %v1853_v34 = vunpack.i.l.bf16 %v1852_v16  ;;  %v670_v41 = vadd.f32 %v654_v26, %v506_v33  ;;  %v344_v58 = vadd.f32 %v328_v52, %v180_v37 }
  0xa0   :  { %v181_v20 = vadd.f32 %v2399_v24, %v159_v8 }
  0xa1   :  { %v817_v27 = vmul.f32 %v1854_v19, %v2410_v45  ;;  %v107_v29 = vpop.permute.xlu0 %106  ;;  %v491_v44 = vmul.f32 %v1853_v34, %v2394_v21 }
  0xa2   :  { %v1857_v32 = vpop.permute.xlu1 %1856  ;;  %v160_v17 = vmul.f32 %v2389_v13, %v107_v29 }
  0xa3   :  { %v833_v35 = vadd.f32 %v817_v27, %v669_v25  ;;  %v1859_v38 = vunpack.i.h.bf16 %v1857_v32  ;;  %v1858_v50 = vunpack.i.l.bf16 %v1857_v32  ;;  %v507_v0 = vadd.f32 %v491_v44, %v343_v53 }
  0xa4   :  { %v182_v29 = vadd.f32 %v2399_v24, %v160_v17 }
  0xa5   :  { %v849_v42 = vmax.f32 %v833_v35, 0.0  ;;  %v818_v43 = vmul.f32 %v1859_v38, %v2410_v45  ;;  %v1862_v46 = vpop.permute.xlu0 %1861  ;;  %v492_v1 = vmul.f32 %v1858_v50, %v2394_v21 }
  0xa6   :  { %v1864_v48 = vunpack.i.h.bf16 %v1862_v46  ;;  %v1867_v49 = vpop.permute.xlu1 %1866  ;;  %v1863_v10 = vunpack.i.l.bf16 %v1862_v46 }
  0xa7   :  { %v834_v51 = vadd.f32 %v818_v43, %v670_v41  ;;  %1715 = vmatprep.mubr.msk.f32.mxu0 %vm872_vm2, %v849_v42  ;;  %v1869_v56 = vunpack.i.h.bf16 %v1867_v49  ;;  %v508_v63 = vadd.f32 %v492_v1, %v344_v58  ;;  %v1868_v6 = vunpack.i.l.bf16 %v1867_v49 }
  0xa8   :  { %v655_v55 = vmul.f32 %v1864_v48, %v2403_v28  ;;  %v329_v7 = vmul.f32 %v1863_v10, %v2391_v15 }
  0xa9   :  { %v850_v54 = vmax.f32 %v834_v51, 0.0  ;;  %v112_v59 = vpop.permute.xlu0 %111  ;;  %v656_v23 = vmul.f32 %v1869_v56, %v2403_v28  ;;  %v330_v26 = vmul.f32 %v1868_v6, %v2391_v15 }
  0xaa   :  { %v1872_v60 = vpop.permute.xlu1 %1871  ;;  %v671_v57 = vadd.f32 %v655_v55, %v507_v0  ;;  %v345_v27 = vadd.f32 %v329_v7, %v181_v20  ;;  %v161_v49 = vmul.f32 %v2389_v13, %v112_v59 }
  0xab   :  { %v1874_v3 = vunpack.i.h.bf16 %v1872_v60  ;;  %1716 = vmatmul.mubr.msk.f32.gmra.mrb[2].mxu0 %vm872_vm2, %v850_v54  ;;  %v1873_v2 = vunpack.i.l.bf16 %v1872_v60  ;;  %v672_v9 = vadd.f32 %v656_v23, %v508_v63  ;;  %v346_v41 = vadd.f32 %v330_v26, %v182_v29 }
  0xac   :  { %v183_v58 = vadd.f32 %v2399_v24, %v161_v49 }
  0xad   :  { %v819_v31 = vmul.f32 %v1874_v3, %v2410_v45  ;;  %v117_v62 = vpop.permute.xlu0 %116  ;;  %v493_v12 = vmul.f32 %v1873_v2, %v2394_v21 }
  0xae   :  { %v1877_v61 = vpop.permute.xlu1 %1876  ;;  %v162_v0 = vmul.f32 %v2389_v13, %v117_v62 }
  0xaf   :  { %v835_v4 = vadd.f32 %v819_v31, %v671_v57  ;;  %v1879_v5 = vunpack.i.h.bf16 %v1877_v61  ;;  %v1878_v22 = vunpack.i.l.bf16 %v1877_v61  ;;  %v509_v38 = vadd.f32 %v493_v12, %v345_v27 }
  0xb0   :  { %v184_v62 = vadd.f32 %v2399_v24, %v162_v0 }
  0xb1   :  { %v851_v11 = vmax.f32 %v835_v4, 0.0  ;;  %v820_v14 = vmul.f32 %v1879_v5, %v2410_v45  ;;  %v1882_v16 = vpop.permute.xlu0 %1881  ;;  %v494_v39 = vmul.f32 %v1878_v22, %v2394_v21 }
  0xb2   :  { %v1884_v18 = vunpack.i.h.bf16 %v1882_v16  ;;  %v1887_v19 = vpop.permute.xlu1 %1886  ;;  %v1883_v42 = vunpack.i.l.bf16 %v1882_v16 }
  0xb3   :  { %v836_v25 = vadd.f32 %v820_v14, %v672_v9  ;;  %1718 = vmatprep.mubr.msk.f32.mxu0 %vm872_vm2, %v851_v11  ;;  %v1889_v33 = vunpack.i.h.bf16 %v1887_v19  ;;  %v510_v44 = vadd.f32 %v494_v39, %v346_v41  ;;  %v1888_v53 = vunpack.i.l.bf16 %v1887_v19 }
  0xb4   :  { %v657_v32 = vmul.f32 %v1884_v18, %v2403_v28  ;;  %v331_v54 = vmul.f32 %v1883_v42, %v2391_v15 }
  0xb5   :  { %v852_v30 = vmax.f32 %v836_v25, 0.0  ;;  %v122_v34 = vpop.permute.xlu0 %121  ;;  %v658_v46 = vmul.f32 %v1889_v33, %v2403_v28  ;;  %v332_v23 = vmul.f32 %v1888_v53, %v2391_v15 }
  0xb6   :  { %v1892_v35 = vpop.permute.xlu1 %1891  ;;  %v673_v43 = vadd.f32 %v657_v32, %v509_v38  ;;  %v347_v31 = vadd.f32 %v331_v54, %v183_v58  ;;  %v163_v19 = vmul.f32 %v2389_v13, %v122_v34 }
  0xb7   :  { %v1894_v40 = vunpack.i.h.bf16 %v1892_v35  ;;  %1719 = vmatmul.mubr.msk.f32.gmra.mrb[4].mxu0 %vm872_vm2, %v852_v30  ;;  %v1893_v50 = vunpack.i.l.bf16 %v1892_v35  ;;  %v674_v55 = vadd.f32 %v658_v46, %v510_v44  ;;  %v348_v9 = vadd.f32 %v332_v23, %v184_v62 }
  0xb8   :  { %v185_v41 = vadd.f32 %v2399_v24, %v163_v19 }
  0xb9   :  { %v821_v47 = vmul.f32 %v1894_v40, %v2410_v45  ;;  %v127_v48 = vpop.permute.xlu0 %126  ;;  %v495_v59 = vmul.f32 %v1893_v50, %v2394_v21 }
  0xba   :  { %v1897_v36 = vpop.permute.xlu1 %1896  ;;  %v164_v38 = vmul.f32 %v2389_v13, %v127_v48 }
  0xbb   :  { %v837_v51 = vadd.f32 %v821_v47, %v673_v43  ;;  %v1899_v52 = vunpack.i.h.bf16 %v1897_v36  ;;  %v1898_v10 = vunpack.i.l.bf16 %v1897_v36  ;;  %v511_v5 = vadd.f32 %v495_v59, %v347_v31 }
  0xbc   :  { %v186_v48 = vadd.f32 %v2399_v24, %v164_v38 }
  0xbd   :  { %v853_v56 = vmax.f32 %v837_v51, 0.0  ;;  %v822_v37 = vmul.f32 %v1899_v52, %v2410_v45  ;;  %v1902_v60 = vpop.permute.xlu0 %1901  ;;  %v496_v6 = vmul.f32 %v1898_v10, %v2394_v21 }
  0xbe   :  { %v1904_v1 = vunpack.i.h.bf16 %v1902_v60  ;;  %v1907_v3 = vpop.permute.xlu1 %1906  ;;  %v1903_v11 = vunpack.i.l.bf16 %v1902_v60 }
  0xbf   :  { %v838_v57 = vadd.f32 %v822_v37, %v674_v55  ;;  %1721 = vmatprep.mubr.msk.f32.mxu0 %vm872_vm2, %v853_v56  ;;  %v1909_v63 = vunpack.i.h.bf16 %v1907_v3  ;;  %v512_v12 = vadd.f32 %v496_v6, %v348_v9  ;;  %v1908_v27 = vunpack.i.l.bf16 %v1907_v3 }
  0xc0   :  { %v659_v61 = vmul.f32 %v1904_v1, %v2403_v28  ;;  %v333_v30 = vmul.f32 %v1903_v11, %v2391_v15 }
  0xc1   :  { %v854_v8 = vmax.f32 %v838_v57, 0.0  ;;  %v132_v2 = vpop.permute.xlu0 %131  ;;  %v660_v14 = vmul.f32 %v1909_v63, %v2403_v28  ;;  %v334_v46 = vmul.f32 %v1908_v27, %v2391_v15 }
  0xc2   :  { %v1912_v4 = vpop.permute.xlu1 %1911  ;;  %v675_v18 = vadd.f32 %v659_v61, %v511_v5  ;;  %v349_v47 = vadd.f32 %v333_v30, %v185_v41  ;;  %v165_v56 = vmul.f32 %v2389_v13, %v132_v2 }
  0xc3   :  { %v1914_v7 = vunpack.i.h.bf16 %v1912_v4  ;;  %1722 = vmatmul.mubr.msk.f32.gmra.mrb[6].mxu0 %vm872_vm2, %v854_v8  ;;  %v1913_v22 = vunpack.i.l.bf16 %v1912_v4  ;;  %v676_v32 = vadd.f32 %v660_v14, %v512_v12  ;;  %v350_v55 = vadd.f32 %v334_v46, %v186_v48 }
  0xc4   :  { %v187_v63 = vadd.f32 %v2399_v24, %v165_v56 }
  0xc5   :  { %v823_v16 = vmul.f32 %v1914_v7, %v2410_v45  ;;  %v137_v17 = vpop.permute.xlu0 %136  ;;  %v497_v34 = vmul.f32 %v1913_v22, %v2394_v21 }
  0xc6   :  { %v1917_v20 = vpop.permute.xlu1 %1916  ;;  %v166_v37 = vmul.f32 %v2389_v13, %v137_v17 }
  0xc7   :  { %v1919_v25 = vunpack.i.h.bf16 %v1917_v20  ;;  %v839_v26 = vadd.f32 %v823_v16, %v675_v18  ;;  %v1918_v42 = vunpack.i.l.bf16 %v1917_v20  ;;  %v513_v52 = vadd.f32 %v497_v34, %v349_v47 }
  0xc8   :  { %v188_v2 = vadd.f32 %v2399_v24, %v166_v37 }
  0xc9   :  { %v824_v33 = vmul.f32 %v1919_v25, %v2410_v45  ;;  %v1922_v29 = vpop.permute.xlu0 %1921  ;;  %v855_v35 = vmax.f32 %v839_v26, 0.0  ;;  %v498_v53 = vmul.f32 %v1918_v42, %v2394_v21 }
  0xca   :  { %v1924_v39 = vunpack.i.h.bf16 %v1922_v29  ;;  %v1927_v40 = vpop.permute.xlu1 %1926  ;;  %v1923_v60 = vunpack.i.l.bf16 %v1922_v29 }
  0xcb   :  { %v840_v43 = vadd.f32 %v824_v33, %v676_v32  ;;  %1724 = vmatprep.mubr.msk.f32.mxu1 %vm872_vm2, %v855_v35  ;;  %v1929_v44 = vunpack.i.h.bf16 %v1927_v40  ;;  %v1928_v3 = vunpack.i.l.bf16 %v1927_v40  ;;  %v514_v23 = vadd.f32 %v498_v53, %v350_v55 }
  0xcc   :  { %v661_v36 = vmul.f32 %v1924_v39, %v2403_v28  ;;  %v335_v62 = vmul.f32 %v1923_v60, %v2391_v15 }
  0xcd   :  { %v856_v49 = vmax.f32 %v840_v43, 0.0  ;;  %v142_v50 = vpop.permute.xlu0 %141  ;;  %v662_v1 = vmul.f32 %v1929_v44, %v2403_v28  ;;  %v336_v4 = vmul.f32 %v1928_v3, %v2391_v15 }
  0xce   :  { %v1932_v51 = vpop.permute.xlu1 %1931  ;;  %v677_v0 = vadd.f32 %v661_v36, %v513_v52  ;;  %v167_v11 = vmul.f32 %v2389_v13, %v142_v50  ;;  %v351_v25 = vadd.f32 %v335_v62, %v187_v63 }
  0xcf   :  { %v1934_v54 = vunpack.i.h.bf16 %v1932_v51  ;;  %1725 = vmatmul.mubr.msk.f32.vlgmr.msra.gmra.mrb[0].mxu1 %vm872_vm2, %v856_v49  ;;  %v1933_v10 = vunpack.i.l.bf16 %v1932_v51  ;;  %v678_v5 = vadd.f32 %v662_v1, %v514_v23  ;;  %v352_v30 = vadd.f32 %v336_v4, %v188_v2 }
  0xd0   :  { %v189_v42 = vadd.f32 %v2399_v24, %v167_v11 }
  0xd1   :  { %v825_v58 = vmul.f32 %v1934_v54, %v2410_v45  ;;  %v147_v59 = vpop.permute.xlu0 %146  ;;  %v499_v14 = vmul.f32 %v1933_v10, %v2394_v21 }
  0xd2   :  { %v1937_v57 = vpop.permute.xlu1 %1936  ;;  %v168_v26 = vmul.f32 %v2389_v13, %v147_v59 }
  0xd3   :  { %v841_v31 = vadd.f32 %v825_v58, %v677_v0  ;;  %v1939_v8 = vunpack.i.h.bf16 %v1937_v57  ;;  %v1938_v61 = vunpack.i.l.bf16 %v1937_v57  ;;  %v515_v38 = vadd.f32 %v499_v14, %v351_v25 }
  0xd4   :  { %v190_v47 = vadd.f32 %v2399_v24, %v168_v26 }
  0xd5   :  { %v857_v6 = vmax.f32 %v841_v31, 0.0  ;;  %v826_v7 = vmul.f32 %v1939_v8, %v2410_v45  ;;  %v1942_v9 = vpop.permute.xlu0 %1941  ;;  %v500_v19 = vmul.f32 %v1938_v61, %v2394_v21 }
  0xd6   :  { %v1944_v16 = vunpack.i.h.bf16 %v1942_v9  ;;  %v1943_v17 = vunpack.i.l.bf16 %v1942_v9  ;;  %v1947_v18 = vpop.permute.xlu1 %1946 }
  0xd7   :  { %v842_v20 = vadd.f32 %v826_v7, %v678_v5  ;;  %v1949_v12 = vunpack.i.h.bf16 %v1947_v18  ;;  %v1948_v22 = vunpack.i.l.bf16 %v1947_v18  ;;  %1727 = vmatprep.mubr.msk.f32.mxu1 %vm872_vm2, %v857_v6  ;;  %v516_v43 = vadd.f32 %v500_v19, %v352_v30  ;;  %v1603_v5 = vld [vmem:[%s2639_s5] ss:$0 sm:$0xff] }
  0xd8   :  { %v663_v27 = vmul.f32 %v1944_v16, %v2403_v28  ;;  %v337_v33 = vmul.f32 %v1943_v17, %v2391_v15 }
  0xd9   :  { %v858_v32 = vmax.f32 %v842_v20, 0.0  ;;  %v664_v29 = vmul.f32 %v1949_v12, %v2403_v28  ;;  %v1952_v35 = vpop.permute.xlu0 %1951  ;;  %v338_v39 = vmul.f32 %v1948_v22, %v2391_v15 }
  0xda   :  { %v1954_v40 = vunpack.i.h.bf16 %v1952_v35  ;;  %v1953_v41 = vunpack.i.l.bf16 %v1952_v35  ;;  %v1957_v34 = vpop.permute.xlu1 %1956  ;;  %v679_v49 = vadd.f32 %v663_v27, %v515_v38  ;;  %v353_v50 = vadd.f32 %v337_v33, %v189_v42 }
  0xdb   :  { %v1959_v46 = vunpack.i.h.bf16 %v1957_v34  ;;  %v1958_v13 = vunpack.i.l.bf16 %v1957_v34  ;;  %1728 = vmatmul.mubr.msk.f32.gmra.mrb[2].mxu1 %vm872_vm2, %v858_v32  ;;  %v680_v48 = vadd.f32 %v664_v29, %v516_v43  ;;  %v354_v53 = vadd.f32 %v338_v39, %v190_v47 }
  0xdc   :  { %v827_v36 = vmul.f32 %v1954_v40, %v2410_v45  ;;  %v501_v44 = vmul.f32 %v1953_v41, %v2394_v21 }
  0xdd   :  { %v828_v15 = vmul.f32 %v1959_v46, %v2410_v45  ;;  %v502_v51 = vmul.f32 %v1958_v13, %v2394_v21  ;;  %v1962_v52 = vpop.permute.xlu0 %1961 }
  0xde   :  { %v843_v54 = vadd.f32 %v827_v36, %v679_v49  ;;  %v1964_v55 = vunpack.i.h.bf16 %v1962_v52  ;;  %v1963_v56 = vunpack.i.l.bf16 %v1962_v52  ;;  %v1967_v37 = vpop.permute.xlu1 %1966  ;;  %v517_v60 = vadd.f32 %v501_v44, %v353_v50 }
  0xdf   :  { %v844_v0 = vadd.f32 %v828_v15, %v680_v48  ;;  %v1969_v24 = vunpack.i.h.bf16 %v1967_v37  ;;  %v1968_v1 = vunpack.i.l.bf16 %v1967_v37  ;;  %v518_v58 = vadd.f32 %v502_v51, %v354_v53 }
  0xe0   :  { %v859_v3 = vmax.f32 %v843_v54, 0.0  ;;  %v666_v59 = vmul.f32 %v1964_v55, %v2403_v28  ;;  %v665_v10 = vmul.f32 %v1963_v56, %v2403_v28  ;;  %v1082_v28 = vld [vmem:[%s2638_s6] sm:$0xff] }
  0xe1   :  { %v860_v57 = vmax.f32 %v844_v0, 0.0  ;;  %v830_v21 = vmul.f32 %v1969_v24, %v2410_v45  ;;  %v829_v8 = vmul.f32 %v1968_v1, %v2410_v45  ;;  %v1083_v45 = vld [vmem:[%s2638_s6 + $0x8] sm:$0xff] }
  0xe2   :  { %v681_v23 = vadd.f32 %v665_v10, %v517_v60  ;;  %v682_v31 = vadd.f32 %v666_v59, %v518_v58  ;;  %1730 = vmatprep.mubr.msk.f32.mxu1 %vm872_vm2, %v859_v3  ;;  %v1796_v4 = vpack.c.bf16 %v1083_v45, %v1082_v28  ;;  %v1300_v58 = vld [vmem:[%s2640_s8] sm:$0xff]  ;;  %v1301_v59 = vld [vmem:[%s2640_s8 + $0x8] sm:$0xff] }
  0xe3   :  { %1731 = vmatmul.mubr.msk.f32.gmra.mrb[4].mxu1 %vm872_vm2, %v860_v57  ;;  %v1800_v10 = vpack.c.bf16 %v1301_v59, %v1300_v58  ;;  %v1620_v57 = vld [vmem:[%s2641_s7] ss:$0 sm:$0xff] }
  0xe4   :  { %v845_v61 = vadd.f32 %v829_v8, %v681_v23  ;;  %v846_v63 = vadd.f32 %v830_v21, %v682_v31  ;;  %1797 = vmatprep.subr.bf16.mxu1 %v1796_v4 }
  0xe5   :  { %1799 = vmatpush3.bf16.msra.mxu1 %v1796_v4  ;;  %1801 = vmatprep.subr.bf16.mxu0 %v1800_v10 }
  0xe6   :  { %v861_v2 = vmax.f32 %v845_v61, 0.0  ;;  %v862_v62 = vmax.f32 %v846_v63, 0.0  ;;  %1803 = vmatpush3.bf16.msra.mxu0 %v1800_v10 }
  0xe8   :  { %1733 = vmatprep.mubr.msk.f32.mxu1 %vm872_vm2, %v861_v2 }
  0xe9   :  { %1734 = vmatmul.mubr.msk.f32.gmra.mrb[6].mxu1 %vm872_vm2, %v862_v62 }
 0x172   :  { %v1714_v6 = vpop.f32.mrb[0].mxu0 }
 0x173   :  { %v993_v7 = vadd.f32 %v1714_v6, %v1603_v5  ;;  %v987_v9 = vpop.f32.mrb[1].mxu0 }
 0x174   :  { %v988_v11 = vadd.f32 %v1603_v5, %v987_v9 }
 0x175   :  { %v1067_v16 = vmax.f32 %v993_v7, 0.0 }
 0x176   :  { %v1066_v14 = vmax.f32 %v988_v11, 0.0 }
 0x178   :  { %1740 = vmatprep.mubr.msk.f32.mxu1 %vm872_vm2, %v1066_v14 }
 0x179   :  { %1741 = vmatmul.mubr.msk.f32.vlgmr.msra.gmra.mrb[8].mxu1 %vm872_vm2, %v1067_v16 }
 0x17e   :  { %v1717_v17 = vpop.f32.mrb[2].mxu0 }
 0x17f   :  { %v1003_v18 = vadd.f32 %v1717_v17, %v1603_v5  ;;  %v997_v19 = vpop.f32.mrb[3].mxu0 }
 0x180   :  { %v998_v20 = vadd.f32 %v1603_v5, %v997_v19 }
 0x181   :  { %v1069_v22 = vmax.f32 %v1003_v18, 0.0 }
 0x182   :  { %v1068_v12 = vmax.f32 %v998_v20, 0.0 }
 0x184   :  { %1743 = vmatprep.mubr.msk.f32.mxu1 %vm872_vm2, %v1068_v12 }
 0x185   :  { %1744 = vmatmul.mubr.msk.f32.gmra.mrb[10].mxu1 %vm872_vm2, %v1069_v22 }
 0x18a   :  { %v1720_v25 = vpop.f32.mrb[4].mxu0 }
 0x18b   :  { %v1013_v26 = vadd.f32 %v1720_v25, %v1603_v5  ;;  %v1007_v27 = vpop.f32.mrb[5].mxu0 }
 0x18c   :  { %v1008_v30 = vadd.f32 %v1603_v5, %v1007_v27 }
 0x18d   :  { %v1071_v33 = vmax.f32 %v1013_v26, 0.0 }
 0x18e   :  { %v1070_v32 = vmax.f32 %v1008_v30, 0.0 }
 0x190   :  { %1746 = vmatprep.mubr.msk.f32.mxu1 %vm872_vm2, %v1070_v32 }
 0x191   :  { %1747 = vmatmul.mubr.msk.f32.gmra.mrb[12].mxu1 %vm872_vm2, %v1071_v33 }
 0x196   :  { %v1723_v29 = vpop.f32.mrb[6].mxu0 }
 0x197   :  { %v1023_v35 = vadd.f32 %v1723_v29, %v1603_v5  ;;  %v1017_v38 = vpop.f32.mrb[7].mxu0 }
 0x198   :  { %v1018_v39 = vadd.f32 %v1603_v5, %v1017_v38 }
 0x199   :  { %v1073_v41 = vmax.f32 %v1023_v35, 0.0 }
 0x19a   :  { %v1072_v40 = vmax.f32 %v1018_v39, 0.0 }
 0x19c   :  { %1749 = vmatprep.mubr.msk.f32.mxu1 %vm872_vm2, %v1072_v40 }
 0x19d   :  { %1750 = vmatmul.mubr.msk.f32.gmra.mrb[14].mxu1 %vm872_vm2, %v1073_v41 }
 0x1a2   :  { %v1726_v34 = vpop.f32.mrb[0].mxu1 }
 0x1a3   :  { %v1033_v42 = vadd.f32 %v1726_v34, %v1603_v5  ;;  %v1027_v43 = vpop.f32.mrb[1].mxu1 }
 0x1a4   :  { %v1028_v46 = vadd.f32 %v1603_v5, %v1027_v43 }
 0x1a5   :  { %v1075_v47 = vmax.f32 %v1033_v42, 0.0 }
 0x1a6   :  { %v1074_v13 = vmax.f32 %v1028_v46, 0.0 }
 0x1a8   :  { %1752 = vmatprep.mubr.msk.f32.mxu1 %vm872_vm2, %v1074_v13 }
 0x1a9   :  { %1753 = vmatmul.mubr.msk.f32.gmra.mrb[16].mxu1 %vm872_vm2, %v1075_v47 }
 0x1ae   :  { %v1729_v49 = vpop.f32.mrb[2].mxu1 }
 0x1af   :  { %v1043_v36 = vadd.f32 %v1729_v49, %v1603_v5  ;;  %v1037_v44 = vpop.f32.mrb[3].mxu1 }
 0x1b0   :  { %v1038_v50 = vadd.f32 %v1603_v5, %v1037_v44 }
 0x1b1   :  { %v1077_v15 = vmax.f32 %v1043_v36, 0.0 }
 0x1b2   :  { %v1076_v48 = vmax.f32 %v1038_v50, 0.0 }
 0x1b4   :  { %1755 = vmatprep.mubr.msk.f32.mxu1 %vm872_vm2, %v1076_v48 }
 0x1b5   :  { %1756 = vmatmul.mubr.msk.f32.gmra.mrb[18].mxu1 %vm872_vm2, %v1077_v15 }
 0x1b6   :  { %v1732_v51 = vpop.f32.mrb[4].mxu1 }
 0x1b7   :  { %v1053_v52 = vadd.f32 %v1732_v51, %v1603_v5  ;;  %v1047_v53 = vpop.f32.mrb[5].mxu1  ;;  %v1637_v51 = vld [vmem:[%s2642_s9] ss:$0 sm:$0xff] }
 0x1b8   :  { %v1048_v54 = vadd.f32 %v1603_v5, %v1047_v53 }
 0x1b9   :  { %v1079_v56 = vmax.f32 %v1053_v52, 0.0 }
 0x1ba   :  { %v1078_v55 = vmax.f32 %v1048_v54, 0.0 }
 0x1bc   :  { %v1735_v37 = vpop.f32.mrb[6].mxu1  ;;  %1758 = vmatprep.mubr.msk.f32.mxu1 %vm872_vm2, %v1078_v55 }
 0x1bd   :  { %v1063_v60 = vadd.f32 %v1735_v37, %v1603_v5  ;;  %v1057_v0 = vpop.f32.mrb[7].mxu1  ;;  %1759 = vmatmul.mubr.msk.f32.gmra.mrb[20].mxu1 %vm872_vm2, %v1079_v56 }
 0x1be   :  { %v1058_v24 = vadd.f32 %v1603_v5, %v1057_v0 }
 0x1bf   :  { %v1081_v3 = vmax.f32 %v1063_v60, 0.0 }
 0x1c0   :  { %v1080_v1 = vmax.f32 %v1058_v24, 0.0 }
 0x1c2   :  { %1761 = vmatprep.mubr.msk.f32.mxu1 %vm872_vm2, %v1080_v1 }
 0x1c3   :  { %1762 = vmatmul.mubr.msk.f32.gmra.mrb[22].mxu1 %vm872_vm2, %v1081_v3 }
 0x24c   :  { %v1742_v23 = vpop.f32.mrb[8].mxu1 }
 0x24d   :  { %v1211_v31 = vadd.f32 %v1742_v23, %v1620_v57  ;;  %v1205_v21 = vpop.f32.mrb[9].mxu1 }
 0x24e   :  { %v1206_v8 = vadd.f32 %v1620_v57, %v1205_v21 }
 0x24f   :  { %v1285_v63 = vmax.f32 %v1211_v31, 0.0 }
 0x250   :  { %v1284_v61 = vmax.f32 %v1206_v8, 0.0 }
 0x252   :  { %1768 = vmatprep.mubr.msk.f32.mxu0 %vm872_vm2, %v1284_v61 }
 0x253   :  { %1769 = vmatmul.mubr.msk.f32.vlgmr.msra.gmra.mrb[8].mxu0 %vm872_vm2, %v1285_v63 }
 0x258   :  { %v1745_v2 = vpop.f32.mrb[10].mxu1 }
 0x259   :  { %v1221_v62 = vadd.f32 %v1745_v2, %v1620_v57  ;;  %v1215_v28 = vpop.f32.mrb[11].mxu1 }
 0x25a   :  { %v1216_v45 = vadd.f32 %v1620_v57, %v1215_v28 }
 0x25b   :  { %v1287_v5 = vmax.f32 %v1221_v62, 0.0 }
 0x25c   :  { %v1286_v4 = vmax.f32 %v1216_v45, 0.0 }
 0x25e   :  { %1771 = vmatprep.mubr.msk.f32.mxu0 %vm872_vm2, %v1286_v4 }
 0x25f   :  { %1772 = vmatmul.mubr.msk.f32.gmra.mrb[10].mxu0 %vm872_vm2, %v1287_v5 }
 0x264   :  { %v1748_v6 = vpop.f32.mrb[12].mxu1 }
 0x265   :  { %v1231_v7 = vadd.f32 %v1748_v6, %v1620_v57  ;;  %v1225_v9 = vpop.f32.mrb[13].mxu1 }
 0x266   :  { %v1226_v11 = vadd.f32 %v1620_v57, %v1225_v9 }
 0x267   :  { %v1289_v16 = vmax.f32 %v1231_v7, 0.0 }
 0x268   :  { %v1288_v14 = vmax.f32 %v1226_v11, 0.0 }
 0x26a   :  { %1774 = vmatprep.mubr.msk.f32.mxu0 %vm872_vm2, %v1288_v14 }
 0x26b   :  { %1775 = vmatmul.mubr.msk.f32.gmra.mrb[12].mxu0 %vm872_vm2, %v1289_v16 }
 0x270   :  { %v1751_v17 = vpop.f32.mrb[14].mxu1 }
 0x271   :  { %v1241_v18 = vadd.f32 %v1751_v17, %v1620_v57  ;;  %v1235_v19 = vpop.f32.mrb[15].mxu1 }
 0x272   :  { %v1236_v20 = vadd.f32 %v1620_v57, %v1235_v19 }
 0x273   :  { %v1291_v22 = vmax.f32 %v1241_v18, 0.0 }
 0x274   :  { %v1290_v12 = vmax.f32 %v1236_v20, 0.0 }
 0x276   :  { %1777 = vmatprep.mubr.msk.f32.mxu0 %vm872_vm2, %v1290_v12 }
 0x277   :  { %1778 = vmatmul.mubr.msk.f32.gmra.mrb[14].mxu0 %vm872_vm2, %v1291_v22 }
 0x27c   :  { %v1754_v25 = vpop.f32.mrb[16].mxu1 }
 0x27d   :  { %v1251_v26 = vadd.f32 %v1754_v25, %v1620_v57  ;;  %v1245_v27 = vpop.f32.mrb[17].mxu1 }
 0x27e   :  { %v1246_v30 = vadd.f32 %v1620_v57, %v1245_v27 }
 0x27f   :  { %v1293_v33 = vmax.f32 %v1251_v26, 0.0 }
 0x280   :  { %v1292_v32 = vmax.f32 %v1246_v30, 0.0 }
 0x282   :  { %1780 = vmatprep.mubr.msk.f32.mxu0 %vm872_vm2, %v1292_v32 }
 0x283   :  { %1781 = vmatmul.mubr.msk.f32.gmra.mrb[16].mxu0 %vm872_vm2, %v1293_v33 }
 0x288   :  { %v1757_v29 = vpop.f32.mrb[18].mxu1 }
 0x289   :  { %v1261_v35 = vadd.f32 %v1757_v29, %v1620_v57  ;;  %v1255_v38 = vpop.f32.mrb[19].mxu1 }
 0x28a   :  { %v1256_v39 = vadd.f32 %v1620_v57, %v1255_v38 }
 0x28b   :  { %v1295_v41 = vmax.f32 %v1261_v35, 0.0 }
 0x28c   :  { %v1294_v40 = vmax.f32 %v1256_v39, 0.0 }
 0x28e   :  { %1783 = vmatprep.mubr.msk.f32.mxu0 %vm872_vm2, %v1294_v40 }
 0x28f   :  { %1784 = vmatmul.mubr.msk.f32.gmra.mrb[18].mxu0 %vm872_vm2, %v1295_v41 }
 0x290   :  { %v1760_v34 = vpop.f32.mrb[20].mxu1 }
 0x291   :  { %v1271_v42 = vadd.f32 %v1760_v34, %v1620_v57  ;;  %v1265_v43 = vpop.f32.mrb[21].mxu1 }
 0x292   :  { %v1266_v46 = vadd.f32 %v1620_v57, %v1265_v43 }
 0x293   :  { %v1297_v47 = vmax.f32 %v1271_v42, 0.0 }
 0x294   :  { %v1296_v13 = vmax.f32 %v1266_v46, 0.0 }
 0x296   :  { %v1763_v49 = vpop.f32.mrb[22].mxu1  ;;  %1786 = vmatprep.mubr.msk.f32.mxu0 %vm872_vm2, %v1296_v13 }
 0x297   :  { %v1281_v36 = vadd.f32 %v1763_v49, %v1620_v57  ;;  %v1275_v44 = vpop.f32.mrb[23].mxu1  ;;  %1787 = vmatmul.mubr.msk.f32.gmra.mrb[20].mxu0 %vm872_vm2, %v1297_v47 }
 0x298   :  { %v1276_v50 = vadd.f32 %v1620_v57, %v1275_v44 }
 0x299   :  { %v1299_v15 = vmax.f32 %v1281_v36, 0.0 }
 0x29a   :  { %v1298_v48 = vmax.f32 %v1276_v50, 0.0 }
 0x29c   :  { %1789 = vmatprep.mubr.msk.f32.mxu0 %vm872_vm2, %v1298_v48 }
 0x29d   :  { %1790 = vmatmul.mubr.msk.f32.gmra.mrb[22].mxu0 %vm872_vm2, %v1299_v15 }
 0x326   :  { %v1770_v52 = vpop.f32.mrb[8].mxu0 }
 0x327   :  { %v1429_v53 = vadd.f32 %v1770_v52, %v1637_v51  ;;  %v1423_v54 = vpop.f32.mrb[9].mxu0 }
 0x328   :  { %v1424_v55 = vadd.f32 %v1637_v51, %v1423_v54 }
 0x329   :  { %v1503_v56 = vmax.f32 %v1429_v53, 0.0 }
 0x32a   :  { %v1502_v37 = vmax.f32 %v1424_v55, 0.0 }
 0x32b   :  { %1519 = vst.msk [vmem:[%s2643_s10 + $0x8] sm:$0xff] %vm872_vm2, %v1503_v56 }
 0x32c   :  { %1518 = vst.msk [vmem:[%s2643_s10] sm:$0xff] %vm872_vm2, %v1502_v37 }
 0x332   :  { %v1773_v60 = vpop.f32.mrb[10].mxu0 }
 0x333   :  { %v1439_v0 = vadd.f32 %v1773_v60, %v1637_v51  ;;  %v1433_v24 = vpop.f32.mrb[11].mxu0 }
 0x334   :  { %v1434_v1 = vadd.f32 %v1637_v51, %v1433_v24 }
 0x335   :  { %v1505_v3 = vmax.f32 %v1439_v0, 0.0 }
 0x336   :  { %v1504_v58 = vmax.f32 %v1434_v1, 0.0 }
 0x337   :  { %1521 = vst.msk [vmem:[%s2643_s10 + $0x18] sm:$0xff] %vm872_vm2, %v1505_v3 }
 0x338   :  { %1520 = vst.msk [vmem:[%s2643_s10 + $0x10] sm:$0xff] %vm872_vm2, %v1504_v58 }
 0x33e   :  { %v1776_v59 = vpop.f32.mrb[12].mxu0 }
 0x33f   :  { %v1449_v10 = vadd.f32 %v1776_v59, %v1637_v51  ;;  %v1443_v57 = vpop.f32.mrb[13].mxu0 }
 0x340   :  { %v1444_v23 = vadd.f32 %v1637_v51, %v1443_v57 }
 0x341   :  { %v1507_v31 = vmax.f32 %v1449_v10, 0.0 }
 0x342   :  { %v1506_v21 = vmax.f32 %v1444_v23, 0.0 }
 0x343   :  { %1523 = vst.msk [vmem:[%s2643_s10 + $0x28] sm:$0xff] %vm872_vm2, %v1507_v31 }
 0x344   :  { %1522 = vst.msk [vmem:[%s2643_s10 + $0x20] sm:$0xff] %vm872_vm2, %v1506_v21 }
 0x34a   :  { %v1779_v8 = vpop.f32.mrb[14].mxu0 }
 0x34b   :  { %v1459_v61 = vadd.f32 %v1779_v8, %v1637_v51  ;;  %v1453_v63 = vpop.f32.mrb[15].mxu0 }
 0x34c   :  { %v1454_v2 = vadd.f32 %v1637_v51, %v1453_v63 }
 0x34d   :  { %v1509_v62 = vmax.f32 %v1459_v61, 0.0 }
 0x34e   :  { %v1508_v28 = vmax.f32 %v1454_v2, 0.0 }
 0x34f   :  { %1525 = vst.msk [vmem:[%s2643_s10 + $0x38] sm:$0xff] %vm872_vm2, %v1509_v62 }
 0x350   :  { %1524 = vst.msk [vmem:[%s2643_s10 + $0x30] sm:$0xff] %vm872_vm2, %v1508_v28 }
 0x356   :  { %v1782_v45 = vpop.f32.mrb[16].mxu0 }
 0x357   :  { %v1469_v4 = vadd.f32 %v1782_v45, %v1637_v51  ;;  %v1463_v5 = vpop.f32.mrb[17].mxu0 }
 0x358   :  { %v1464_v6 = vadd.f32 %v1637_v51, %v1463_v5 }
 0x359   :  { %v1511_v7 = vmax.f32 %v1469_v4, 0.0 }
 0x35a   :  { %v1510_v9 = vmax.f32 %v1464_v6, 0.0 }
 0x35b   :  { %1527 = vst.msk [vmem:[%s2643_s10 + $0x48] sm:$0xff] %vm872_vm2, %v1511_v7 }
 0x35c   :  { %1526 = vst.msk [vmem:[%s2643_s10 + $0x40] sm:$0xff] %vm872_vm2, %v1510_v9 }
 0x362   :  { %v1785_v11 = vpop.f32.mrb[18].mxu0 }
 0x363   :  { %v1479_v14 = vadd.f32 %v1785_v11, %v1637_v51  ;;  %v1473_v16 = vpop.f32.mrb[19].mxu0 }
 0x364   :  { %v1474_v17 = vadd.f32 %v1637_v51, %v1473_v16 }
 0x365   :  { %v1513_v18 = vmax.f32 %v1479_v14, 0.0 }
 0x366   :  { %v1512_v19 = vmax.f32 %v1474_v17, 0.0 }
 0x367   :  { %1529 = vst.msk [vmem:[%s2643_s10 + $0x58] sm:$0xff] %vm872_vm2, %v1513_v18 }
 0x368   :  { %1528 = vst.msk [vmem:[%s2643_s10 + $0x50] sm:$0xff] %vm872_vm2, %v1512_v19 }
 0x36a   :  { %v1788_v20 = vpop.f32.mrb[20].mxu0 }
 0x36b   :  { %v1489_v12 = vadd.f32 %v1788_v20, %v1637_v51  ;;  %v1483_v22 = vpop.f32.mrb[21].mxu0 }
 0x36c   :  { %v1484_v25 = vadd.f32 %v1637_v51, %v1483_v22 }
 0x36d   :  { %v1515_v26 = vmax.f32 %v1489_v12, 0.0 }
 0x36e   :  { %v1514_v27 = vmax.f32 %v1484_v25, 0.0 }
 0x36f   :  { %1531 = vst.msk [vmem:[%s2643_s10 + $0x68] sm:$0xff] %vm872_vm2, %v1515_v26 }
 0x370   :  { %1530 = vst.msk [vmem:[%s2643_s10 + $0x60] sm:$0xff] %vm872_vm2, %v1514_v27  ;;  %v1791_v30 = vpop.f32.mrb[22].mxu0 }
 0x371   :  { %v1499_v32 = vadd.f32 %v1791_v30, %v1637_v51  ;;  %v1493_v33 = vpop.f32.mrb[23].mxu0 }
 0x372   :  { %v1494_v29 = vadd.f32 %v1637_v51, %v1493_v33 }
 0x373   :  { %v1517_v35 = vmax.f32 %v1499_v32, 0.0 }
 0x374   :  { %v1516_v38 = vmax.f32 %v1494_v29, 0.0 }
 0x375   :  { %1533 = vst.msk [vmem:[%s2643_s10 + $0x78] sm:$0xff] %vm872_vm2, %v1517_v35 }
 0x376   :  { %1532 = vst.msk [vmem:[%s2643_s10 + $0x70] sm:$0xff] %vm872_vm2, %v1516_v38 }

</bundles_post_ra>
